<compile_context>
chip_gen: v7x
topology: tpu7x:2x2x1
jax: 0.10.0
libtpu: 0.0.40
codegen_flags: <defaults>
</compile_context>

<pallas_src>
import functools

import jax
import jax.numpy as jnp
from jax import lax
from jax.experimental import pallas as pl
from jax.experimental.pallas import tpu as pltpu

# ----------------------------- model config ---------------------------------
N_TOKEN = 128
N_LAYER = 2
N_HEAD = 2
D_HEAD = 16
D_MODEL = 32           # d_embedding defaults to d_model -> no projection
D_INNER = 64
MEMORY_LENGTH = 8
LN_EPS = 1e-5

PACK_ROWS = 8          # sublane-aligned small-parameter pack
PACK_LANES = 128       # lane-dense pack width (== N_TOKEN)


# ----------------------------- small helpers --------------------------------
def _layer_norm(x, eps=LN_EPS):
    # nn.LayerNorm(d_model, elementwise_affine=False)
    mu = jnp.mean(x, axis=-1, keepdims=True)
    var = jnp.mean((x - mu) ** 2, axis=-1, keepdims=True)
    return (x - mu) * lax.rsqrt(var + eps)


def _tensorcores_per_chip():
    """2 on v7x (2 TCs/chip), else 1 (v5e/v6e)."""
    try:
        kind = jax.devices()[0].device_kind.lower()
    except Exception:
        return 1
    return 2 if ("v7" in kind or "tpu7" in kind) else 1


# ------------------------- fused forward kernel -----------------------------
def fused_forward_kernel(emb_ref, p_ref, w_qkv_ref, w_out_ref,
                         w1_ref, w2_ref, w_cls_ref, pack_ref,
                         hid_ref, logits_ref, *, n_layer, n_head, d_head,
                         seq_len):
    BS, D = emb_ref.shape                # BS = (batch block) * seq_len
    S = seq_len
    Bb = BS // S
    H = n_head * d_head
    DI = w1_ref.shape[-1]
    scale = 1.0 / (d_head ** 0.5)
    bf16 = jnp.bfloat16

    h = emb_ref[...]                     # (Bb*S, D)  f32, batch folded into rows
    pack = pack_ref[...]                 # (8, 128)   f32 packed small params

    # Additive causal mask (m_len == 0): triu(ones, diag=1) -> -1e30, which
    # underflows to exactly 0 under exp (no max-subtraction needed for these
    # tiny score magnitudes).
    row = lax.broadcasted_iota(jnp.int32, (S, S), 0)
    col = lax.broadcasted_iota(jnp.int32, (S, S), 1)
    neg_mask = jnp.where(col > row, -1e30, 0.0).astype(jnp.float32)[None]  # (1,S,S)

    u_row = pack[n_layer + 1:n_layer + 2, :]     # (1,128): u flattened in lanes 0:H
    v_row = pack[n_layer + 2:n_layer + 3, :]     # (1,128): v flattened in lanes 0:H
    b_cls = pack[n_layer:n_layer + 1, :]         # (1,128): classification bias

    def mm(a, b_mat):                    # 2-D MXU dot: bf16 operands, f32 accumulate
        return jnp.dot(a.astype(bf16), b_mat, preferred_element_type=jnp.float32)

    for l in range(n_layer):             # static unrolled loop over layers
        Wl = w_qkv_ref[l]                               # (3, D, H) bf16
        Q = mm(h, Wl[0]).reshape(Bb, S, H)              # (Bb, S, H) f32
        K = mm(h, Wl[1]).reshape(Bb, S, H).astype(bf16)
        V = mm(h, Wl[2]).reshape(Bb, S, H).astype(bf16)
        # pe projection precomputed in the wrapper (batch-invariant).
        Pl = jnp.broadcast_to(p_ref[l][None], (Bb, S, H))   # (Bb, S, H) bf16

        head_outs = []
        for hh in range(n_head):         # per-head lane slices (no transposes)
            sl = slice(hh * d_head, (hh + 1) * d_head)
            Qh = Q[..., sl]
            Qu = (Qh + u_row[:, sl]).astype(bf16)
            Qv = (Qh + v_row[:, sl]).astype(bf16)
            AC = jnp.einsum('bqd,bkd->bqk', Qu, K[..., sl],
                            preferred_element_type=jnp.float32)
            BD = jnp.einsum('bqd,bkd->bqk', Qv, Pl[..., sl],
                            preferred_element_type=jnp.float32)
            # NOTE: reference discards relative_shift(BD) -> intentionally omitted.
            score = (AC + BD) * scale + neg_mask
            p = jnp.exp(score)
            p = p * pl.reciprocal(jnp.sum(p, axis=-1, keepdims=True))
            head_outs.append(
                jnp.einsum('bqk,bkd->bqd', p.astype(bf16), V[..., sl],
                           preferred_element_type=jnp.float32))
        attn_vec = jnp.concatenate(head_outs, axis=-1).reshape(BS, H)

        attn_out = mm(attn_vec, w_out_ref[l])           # (BS, D)
        x = _layer_norm(h + attn_out)                   # post-norm, no affine

        h1 = jnp.maximum(mm(x, w1_ref[l]) + pack[l:l + 1, 0:DI], 0.0)
        h2 = mm(h1, w2_ref[l]) + pack[l:l + 1, DI:DI + D]
        h = _layer_norm(x + h2)

        hid_ref[l] = h.astype(hid_ref.dtype)

    # Final classification (lane-dense: N_TOKEN = 128).
    logits_ref[...] = (mm(h, w_cls_ref[...]) + b_cls).astype(logits_ref.dtype)


def _pack_small_params(params):
    """Pack u, v, b1, b2, b_cls into one (8, 128) lane-dense f32 array."""
    H = N_HEAD * D_HEAD
    pack = jnp.zeros((PACK_ROWS, PACK_LANES), jnp.float32)
    for l in range(N_LAYER):
        pack = pack.at[l, 0:D_INNER].set(params["b1"][l, 0])
        pack = pack.at[l, D_INNER:D_INNER + D_MODEL].set(params["b2"][l, 0])
    pack = pack.at[N_LAYER, 0:N_TOKEN].set(params["b_cls"][0])
    pack = pack.at[N_LAYER + 1, 0:H].set(params["u"].reshape(-1))
    pack = pack.at[N_LAYER + 2, 0:H].set(params["v"].reshape(-1))
    return pack


def fused_forward(word_emb, pe, params):
    """Runs both decoder layers + classification in one pallas_call."""
    B, S, D = word_emb.shape
    H = N_HEAD * D_HEAD
    L = N_LAYER
    N = params["w_cls"].shape[1]
    bf16 = jnp.bfloat16

    # Hoisted batch-invariant positional projection: (L, S, H).
    P = jnp.einsum('kd,ldh->lkh', pe, params["w_pe"]).astype(bf16)

    emb_flat = word_emb.reshape(B * S, D)
    w_qkv = params["w_qkv"].astype(bf16)   # (L, 3, D, H)
    w_out = params["w_out"].astype(bf16)   # (L, H, D)
    w1 = params["w1"].astype(bf16)         # (L, D, D_INNER)
    w2 = params["w2"].astype(bf16)         # (L, D_INNER, D)
    w_cls = params["w_cls"].astype(bf16)   # (D, N)
    pack = _pack_small_params(params)      # (8, 128) f32

    # Single grid step (batch inside the kernel) on 1-TC chips (v5e/v6e);
    # grid over the batch, "parallel", on 2-TC chips (v7x).
    n_tc = _tensorcores_per_chip()
    grid_b = n_tc if (n_tc > 1 and B % n_tc == 0) else 1
    bb = B // grid_b

    kernel = functools.partial(fused_forward_kernel, n_layer=L,
                               n_head=N_HEAD, d_head=D_HEAD, seq_len=S)
    full2 = lambda b: (0, 0)
    full3 = lambda b: (0, 0, 0)
    full4 = lambda b: (0, 0, 0, 0)

    hid_flat, logits_flat = pl.pallas_call(
        kernel,
        out_shape=(
            jax.ShapeDtypeStruct((L, B * S, D), word_emb.dtype),   # per-layer hiddens
            jax.ShapeDtypeStruct((B * S, N), word_emb.dtype),      # logits
        ),
        grid=(grid_b,),
        in_specs=[
            pl.BlockSpec((bb * S, D), lambda b: (b, 0)),           # word emb (rows)
            pl.BlockSpec((L, S, H), full3),                        # P = pe @ W_pe
            pl.BlockSpec((L, 3, D, H), full4),                     # W_q | W_k | W_v
            pl.BlockSpec((L, H, D), full3),                        # W_out
            pl.BlockSpec((L, D, D_INNER), full3),                  # W1
            pl.BlockSpec((L, D_INNER, D), full3),                  # W2
            pl.BlockSpec((D, N), full2),                           # W_cls
            pl.BlockSpec((PACK_ROWS, PACK_LANES), full2),          # u/v/b1/b2/b_cls
        ],
        out_specs=(
            pl.BlockSpec((L, bb * S, D), lambda b: (0, b, 0)),
            pl.BlockSpec((bb * S, N), lambda b: (b, 0)),
        ),
        compiler_params=pltpu.CompilerParams(
            dimension_semantics=("parallel",)),
    )(emb_flat, P, w_qkv, w_out, w1, w2, w_cls, pack)
    return hid_flat, logits_flat


# ------------------------------- JAX glue -----------------------------------
def positional_embedding(k_len, d_model, dtype=jnp.float32):
    # position_seq = [k_len-1, ..., 0]; pe = [sin(p*inv_freq), cos(p*inv_freq)]
    position_seq = jnp.arange(k_len - 1, -1, -1, dtype=dtype)
    inv_freq = 1.0 / (10000.0 ** (jnp.arange(0.0, d_model, 2.0, dtype=dtype)
                                  / d_model))
    pp = position_seq[:, None] * inv_freq[None, :]
    return jnp.concatenate([jnp.sin(pp), jnp.cos(pp)], axis=1)   # (k_len, d)


def transformer_xl_forward(X, Y, params):
    B, q_len = X.shape
    # AdaptiveEmbedding: d_embedding == d_model -> plain lookup, no projection.
    word_emb = jnp.take(params["embedding"], X, axis=0)          # (B, q, D)
    k_len = q_len                                                # mems=None
    pe = positional_embedding(k_len, D_MODEL, word_emb.dtype)    # (k, D)

    hid_flat, logits_flat = fused_forward(word_emb, pe, params)
    hiddens_stacked = hid_flat.reshape(N_LAYER, B, q_len, D_MODEL)
    logits = logits_flat.reshape(B, q_len, N_TOKEN)

    hiddens = [word_emb] + [hiddens_stacked[i] for i in range(N_LAYER)]

    # update_memory (reference swaps m_len/q_len at the call site, mems=None):
    end_index = q_len
    begin_index = max(0, end_index - MEMORY_LENGTH)
    # TODO(synk): reference slices 3-D hiddens with 4 indices (cat[:, b:e, :, :]);
    # we use the well-defined 3-D slice.
    new_mems = [h[:, begin_index:end_index, :] for h in hiddens]

    y_len = Y.shape[1]
    logits_y = logits[:, -y_len:, :]                             # (B, y, N)
    return logits_y.reshape(B * y_len, -1), new_mems


# --------------------------- parameter init ----------------------------------
def init_params(key):
    def nrm(k, shape, scale=0.02):
        return scale * jax.random.normal(k, shape, dtype=jnp.float32)

    H = N_HEAD * D_HEAD
    ks = iter(jax.random.split(key, 16))
    return {
        "embedding": nrm(next(ks), (N_TOKEN, D_MODEL)),
        "u": nrm(next(ks), (N_HEAD, D_HEAD)),
        "v": nrm(next(ks), (N_HEAD, D_HEAD)),
        "w_cls": nrm(next(ks), (D_MODEL, N_TOKEN)),
        "b_cls": nrm(next(ks), (1, N_TOKEN)),
        # per-layer weights stacked along a leading layer axis
        "w_qkv": nrm(next(ks), (N_LAYER, 3, D_MODEL, H)),    # [Wq | Wk | Wv]
        "w_pe": nrm(next(ks), (N_LAYER, D_MODEL, H)),
        "w_out": nrm(next(ks), (N_LAYER, H, D_MODEL)),
        "w1": nrm(next(ks), (N_LAYER, D_MODEL, D_INNER)),
        "b1": nrm(next(ks), (N_LAYER, 1, D_INNER)),
        "w2": nrm(next(ks), (N_LAYER, D_INNER, D_MODEL)),
        "b2": nrm(next(ks), (N_LAYER, 1, D_MODEL)),
    }


# --------------------------------- main --------------------------------------
if __name__ == "__main__":
    key = jax.random.PRNGKey(0)
    pkey, xkey, ykey = jax.random.split(key, 3)
    params = init_params(pkey)

    B, SEQ = 2, 8
    X = jax.random.randint(xkey, (B, SEQ), 0, N_TOKEN, dtype=jnp.int32)
    Y = jax.random.randint(ykey, (B, SEQ), 0, N_TOKEN, dtype=jnp.int32)

    logits, new_mems = transformer_xl_forward(X, Y, params)
    logits = jax.block_until_ready(logits)
    new_mems = jax.block_until_ready(new_mems)

    assert logits.shape == (B * SEQ, N_TOKEN), logits.shape
    assert len(new_mems) == N_LAYER + 1
    assert all(m.shape == (B, SEQ, D_MODEL) for m in new_mems)
    assert bool(jnp.all(jnp.isfinite(logits)))
    print("KERNEL_OK")
</pallas_src>

<mosaic_0001>
module attributes {stable_mosaic.version = 11 : i64} {
  func.func @fused_forward_kernel(%arg0: i32, %arg1: memref<16x32xf32, #tpu.memory_space<vmem>>, %arg2: memref<2x8x32xbf16, #tpu.memory_space<vmem>>, %arg3: memref<2x3x32x32xbf16, #tpu.memory_space<vmem>>, %arg4: memref<2x32x32xbf16, #tpu.memory_space<vmem>>, %arg5: memref<2x32x64xbf16, #tpu.memory_space<vmem>>, %arg6: memref<2x64x32xbf16, #tpu.memory_space<vmem>>, %arg7: memref<32x128xbf16, #tpu.memory_space<vmem>>, %arg8: memref<8x128xf32, #tpu.memory_space<vmem>>, %arg9: memref<2x16x32xf32, #tpu.memory_space<vmem>>, %arg10: memref<16x128xf32, #tpu.memory_space<vmem>>) attributes {dimension_semantics = [#tpu.dimension_semantics<parallel>], iteration_bounds = array<i64: 1>, scalar_prefetch = 0 : i64, scratch_operands = 0 : i64, tpu.core_type = #tpu.core_type<tc>, window_params = [{transform_indices = @transform_0, window_bounds = array<i64: 16, 32>}, {pipeline_mode = #tpu.pipeline_mode<synchronous>, transform_indices = @transform_1, window_bounds = array<i64: 2, 8, 32>}, {pipeline_mode = #tpu.pipeline_mode<synchronous>, transform_indices = @transform_2, window_bounds = array<i64: 2, 3, 32, 32>}, {pipeline_mode = #tpu.pipeline_mode<synchronous>, transform_indices = @transform_3, window_bounds = array<i64: 2, 32, 32>}, {pipeline_mode = #tpu.pipeline_mode<synchronous>, transform_indices = @transform_4, window_bounds = array<i64: 2, 32, 64>}, {pipeline_mode = #tpu.pipeline_mode<synchronous>, transform_indices = @transform_5, window_bounds = array<i64: 2, 64, 32>}, {pipeline_mode = #tpu.pipeline_mode<synchronous>, transform_indices = @transform_6, window_bounds = array<i64: 32, 128>}, {pipeline_mode = #tpu.pipeline_mode<synchronous>, transform_indices = @transform_7, window_bounds = array<i64: 8, 128>}, {transform_indices = @transform_8, window_bounds = array<i64: 2, 16, 32>}, {transform_indices = @transform_9, window_bounds = array<i64: 16, 128>}]} {
    %c0 = arith.constant 0 : index
    %c0_0 = arith.constant 0 : index
    %0 = vector.load %arg1[%c0, %c0_0] : memref<16x32xf32, #tpu.memory_space<vmem>>, vector<16x32xf32>
    %c0_1 = arith.constant 0 : index
    %c0_2 = arith.constant 0 : index
    %1 = vector.load %arg8[%c0_1, %c0_2] : memref<8x128xf32, #tpu.memory_space<vmem>>, vector<8x128xf32>
    %2 = tpu.iota {dimensions = array<i32: 0>} : vector<8x8xi32>
    %3 = tpu.iota {dimensions = array<i32: 1>} : vector<8x8xi32>
    %4 = arith.cmpi sgt, %3, %2 : vector<8x8xi32>
    %cst = arith.constant -1.000000e+30 : f32
    %cst_3 = arith.constant 0.000000e+00 : f32
    %5 = vector.broadcast %cst : f32 to vector<8x8xf32>
    %6 = vector.broadcast %cst_3 : f32 to vector<8x8xf32>
    %7 = arith.select %4, %5, %6 : vector<8x8xi1>, vector<8x8xf32>
    %8 = vector.shape_cast %7 : vector<8x8xf32> to vector<1x8x8xf32>
    %9 = vector.extract_strided_slice %1 {offsets = [3, 0], sizes = [1, 128], strides = [1, 1]} : vector<8x128xf32> to vector<1x128xf32>
    %10 = vector.extract_strided_slice %1 {offsets = [4, 0], sizes = [1, 128], strides = [1, 1]} : vector<8x128xf32> to vector<1x128xf32>
    %11 = vector.extract_strided_slice %1 {offsets = [2, 0], sizes = [1, 128], strides = [1, 1]} : vector<8x128xf32> to vector<1x128xf32>
    %c0_4 = arith.constant 0 : index
    %c0_5 = arith.constant 0 : index
    %c0_6 = arith.constant 0 : index
    %c0_7 = arith.constant 0 : index
    %12 = vector.load %arg3[%c0_4, %c0_5, %c0_6, %c0_7] : memref<2x3x32x32xbf16, #tpu.memory_space<vmem>>, vector<1x3x32x32xbf16>
    %13 = vector.shape_cast %12 : vector<1x3x32x32xbf16> to vector<3x32x32xbf16>
    %14 = vector.extract_strided_slice %13 {offsets = [0, 0, 0], sizes = [1, 32, 32], strides = [1, 1, 1]} : vector<3x32x32xbf16> to vector<1x32x32xbf16>
    %15 = vector.shape_cast %14 : vector<1x32x32xbf16> to vector<32x32xbf16>
    %16 = arith.truncf %0 : vector<16x32xf32> to vector<16x32xbf16>
    %cst_8 = arith.constant dense<0.000000e+00> : vector<16x32xf32>
    %17 = tpu.matmul %16, %15, %cst_8 {dimension_numbers = #tpu.dot_dimension_numbers<[1], [0], [0], [1], [0, 0, 1, 1], [], []>} : vector<16x32xbf16>, vector<32x32xbf16>, vector<16x32xf32> -> vector<16x32xf32>
    %18 = vector.shape_cast %17 : vector<16x32xf32> to vector<2x8x32xf32>
    %19 = vector.extract_strided_slice %13 {offsets = [1, 0, 0], sizes = [1, 32, 32], strides = [1, 1, 1]} : vector<3x32x32xbf16> to vector<1x32x32xbf16>
    %20 = vector.shape_cast %19 : vector<1x32x32xbf16> to vector<32x32xbf16>
    %21 = arith.truncf %0 : vector<16x32xf32> to vector<16x32xbf16>
    %cst_9 = arith.constant dense<0.000000e+00> : vector<16x32xf32>
    %22 = tpu.matmul %21, %20, %cst_9 {dimension_numbers = #tpu.dot_dimension_numbers<[1], [0], [0], [1], [0, 0, 1, 1], [], []>} : vector<16x32xbf16>, vector<32x32xbf16>, vector<16x32xf32> -> vector<16x32xf32>
    %23 = vector.shape_cast %22 : vector<16x32xf32> to vector<2x8x32xf32>
    %24 = arith.truncf %23 : vector<2x8x32xf32> to vector<2x8x32xbf16>
    %25 = vector.extract_strided_slice %13 {offsets = [2, 0, 0], sizes = [1, 32, 32], strides = [1, 1, 1]} : vector<3x32x32xbf16> to vector<1x32x32xbf16>
    %26 = vector.shape_cast %25 : vector<1x32x32xbf16> to vector<32x32xbf16>
    %27 = arith.truncf %0 : vector<16x32xf32> to vector<16x32xbf16>
    %cst_10 = arith.constant dense<0.000000e+00> : vector<16x32xf32>
    %28 = tpu.matmul %27, %26, %cst_10 {dimension_numbers = #tpu.dot_dimension_numbers<[1], [0], [0], [1], [0, 0, 1, 1], [], []>} : vector<16x32xbf16>, vector<32x32xbf16>, vector<16x32xf32> -> vector<16x32xf32>
    %29 = vector.shape_cast %28 : vector<16x32xf32> to vector<2x8x32xf32>
    %30 = arith.truncf %29 : vector<2x8x32xf32> to vector<2x8x32xbf16>
    %c0_11 = arith.constant 0 : index
    %c0_12 = arith.constant 0 : index
    %c0_13 = arith.constant 0 : index
    %31 = vector.load %arg2[%c0_11, %c0_12, %c0_13] : memref<2x8x32xbf16, #tpu.memory_space<vmem>>, vector<1x8x32xbf16>
    %32 = vector.shape_cast %31 : vector<1x8x32xbf16> to vector<8x32xbf16>
    %33 = vector.shape_cast %32 : vector<8x32xbf16> to vector<1x8x32xbf16>
    %34 = vector.shape_cast %33 : vector<1x8x32xbf16> to vector<1x8x32xbf16>
    %35 = vector.broadcast %34 : vector<1x8x32xbf16> to vector<2x8x32xbf16>
    %36 = vector.extract_strided_slice %18 {offsets = [0, 0, 0], sizes = [2, 8, 16], strides = [1, 1, 1]} : vector<2x8x32xf32> to vector<2x8x16xf32>
    %37 = vector.extract_strided_slice %9 {offsets = [0, 0], sizes = [1, 16], strides = [1, 1]} : vector<1x128xf32> to vector<1x16xf32>
    %38 = vector.shape_cast %37 : vector<1x16xf32> to vector<1x1x16xf32>
    %39 = vector.broadcast %38 : vector<1x1x16xf32> to vector<2x8x16xf32>
    %40 = arith.addf %36, %39 : vector<2x8x16xf32>
    %41 = arith.truncf %40 : vector<2x8x16xf32> to vector<2x8x16xbf16>
    %42 = vector.extract_strided_slice %10 {offsets = [0, 0], sizes = [1, 16], strides = [1, 1]} : vector<1x128xf32> to vector<1x16xf32>
    %43 = vector.shape_cast %42 : vector<1x16xf32> to vector<1x1x16xf32>
    %44 = vector.broadcast %43 : vector<1x1x16xf32> to vector<2x8x16xf32>
    %45 = arith.addf %36, %44 : vector<2x8x16xf32>
    %46 = arith.truncf %45 : vector<2x8x16xf32> to vector<2x8x16xbf16>
    %47 = vector.extract_strided_slice %24 {offsets = [0, 0, 0], sizes = [2, 8, 16], strides = [1, 1, 1]} : vector<2x8x32xbf16> to vector<2x8x16xbf16>
    "tpu.trace_start"() <{level = 10 : i32, message = "bqd,bkd->bqk"}> : () -> ()
    %cst_14 = arith.constant dense<0.000000e+00> : vector<2x8x8xf32>
    %48 = tpu.matmul %41, %47, %cst_14 {dimension_numbers = #tpu.dot_dimension_numbers<[2], [2], [1], [1], [0, 0, 0, 1, 1, 1], [0], [0]>} : vector<2x8x16xbf16>, vector<2x8x16xbf16>, vector<2x8x8xf32> -> vector<2x8x8xf32>
    "tpu.trace_stop"() : () -> ()
    %49 = vector.extract_strided_slice %35 {offsets = [0, 0, 0], sizes = [2, 8, 16], strides = [1, 1, 1]} : vector<2x8x32xbf16> to vector<2x8x16xbf16>
    "tpu.trace_start"() <{level = 10 : i32, message = "bqd,bkd->bqk"}> : () -> ()
    %cst_15 = arith.constant dense<0.000000e+00> : vector<2x8x8xf32>
    %50 = tpu.matmul %46, %49, %cst_15 {dimension_numbers = #tpu.dot_dimension_numbers<[2], [2], [1], [1], [0, 0, 0, 1, 1, 1], [0], [0]>} : vector<2x8x16xbf16>, vector<2x8x16xbf16>, vector<2x8x8xf32> -> vector<2x8x8xf32>
    "tpu.trace_stop"() : () -> ()
    %51 = arith.addf %48, %50 : vector<2x8x8xf32>
    %cst_16 = arith.constant 2.500000e-01 : f32
    %52 = vector.broadcast %cst_16 : f32 to vector<2x8x8xf32>
    %53 = arith.mulf %51, %52 : vector<2x8x8xf32>
    %54 = vector.broadcast %8 : vector<1x8x8xf32> to vector<2x8x8xf32>
    %55 = arith.addf %53, %54 : vector<2x8x8xf32>
    %56 = math.exp %55 : vector<2x8x8xf32>
    %cst_17 = arith.constant dense<0.000000e+00> : vector<2x8xf32>
    %57 = vector.multi_reduction <add>, %56, %cst_17 [2] : vector<2x8x8xf32> to vector<2x8xf32>
    %58 = vector.shape_cast %57 : vector<2x8xf32> to vector<2x8x1xf32>
    %59 = tpu.reciprocal %58 : vector<2x8x1xf32> -> vector<2x8x1xf32>
    %60 = vector.broadcast %59 : vector<2x8x1xf32> to vector<2x8x8xf32>
    %61 = arith.mulf %56, %60 : vector<2x8x8xf32>
    %62 = arith.truncf %61 : vector<2x8x8xf32> to vector<2x8x8xbf16>
    %63 = vector.extract_strided_slice %30 {offsets = [0, 0, 0], sizes = [2, 8, 16], strides = [1, 1, 1]} : vector<2x8x32xbf16> to vector<2x8x16xbf16>
    "tpu.trace_start"() <{level = 10 : i32, message = "bqk,bkd->bqd"}> : () -> ()
    %cst_18 = arith.constant dense<0.000000e+00> : vector<2x8x16xf32>
    %64 = tpu.matmul %62, %63, %cst_18 {dimension_numbers = #tpu.dot_dimension_numbers<[2], [1], [1], [2], [0, 0, 0, 1, 1, 2], [0], [0]>} : vector<2x8x8xbf16>, vector<2x8x16xbf16>, vector<2x8x16xf32> -> vector<2x8x16xf32>
    "tpu.trace_stop"() : () -> ()
    %65 = vector.extract_strided_slice %18 {offsets = [0, 0, 16], sizes = [2, 8, 16], strides = [1, 1, 1]} : vector<2x8x32xf32> to vector<2x8x16xf32>
    %66 = vector.extract_strided_slice %9 {offsets = [0, 16], sizes = [1, 16], strides = [1, 1]} : vector<1x128xf32> to vector<1x16xf32>
    %67 = vector.shape_cast %66 : vector<1x16xf32> to vector<1x1x16xf32>
    %68 = vector.broadcast %67 : vector<1x1x16xf32> to vector<2x8x16xf32>
    %69 = arith.addf %65, %68 : vector<2x8x16xf32>
    %70 = arith.truncf %69 : vector<2x8x16xf32> to vector<2x8x16xbf16>
    %71 = vector.extract_strided_slice %10 {offsets = [0, 16], sizes = [1, 16], strides = [1, 1]} : vector<1x128xf32> to vector<1x16xf32>
    %72 = vector.shape_cast %71 : vector<1x16xf32> to vector<1x1x16xf32>
    %73 = vector.broadcast %72 : vector<1x1x16xf32> to vector<2x8x16xf32>
    %74 = arith.addf %65, %73 : vector<2x8x16xf32>
    %75 = arith.truncf %74 : vector<2x8x16xf32> to vector<2x8x16xbf16>
    %76 = vector.extract_strided_slice %24 {offsets = [0, 0, 16], sizes = [2, 8, 16], strides = [1, 1, 1]} : vector<2x8x32xbf16> to vector<2x8x16xbf16>
    "tpu.trace_start"() <{level = 10 : i32, message = "bqd,bkd->bqk"}> : () -> ()
    %cst_19 = arith.constant dense<0.000000e+00> : vector<2x8x8xf32>
    %77 = tpu.matmul %70, %76, %cst_19 {dimension_numbers = #tpu.dot_dimension_numbers<[2], [2], [1], [1], [0, 0, 0, 1, 1, 1], [0], [0]>} : vector<2x8x16xbf16>, vector<2x8x16xbf16>, vector<2x8x8xf32> -> vector<2x8x8xf32>
    "tpu.trace_stop"() : () -> ()
    %78 = vector.extract_strided_slice %35 {offsets = [0, 0, 16], sizes = [2, 8, 16], strides = [1, 1, 1]} : vector<2x8x32xbf16> to vector<2x8x16xbf16>
    "tpu.trace_start"() <{level = 10 : i32, message = "bqd,bkd->bqk"}> : () -> ()
    %cst_20 = arith.constant dense<0.000000e+00> : vector<2x8x8xf32>
    %79 = tpu.matmul %75, %78, %cst_20 {dimension_numbers = #tpu.dot_dimension_numbers<[2], [2], [1], [1], [0, 0, 0, 1, 1, 1], [0], [0]>} : vector<2x8x16xbf16>, vector<2x8x16xbf16>, vector<2x8x8xf32> -> vector<2x8x8xf32>
    "tpu.trace_stop"() : () -> ()
    %80 = arith.addf %77, %79 : vector<2x8x8xf32>
    %cst_21 = arith.constant 2.500000e-01 : f32
    %81 = vector.broadcast %cst_21 : f32 to vector<2x8x8xf32>
    %82 = arith.mulf %80, %81 : vector<2x8x8xf32>
    %83 = vector.broadcast %8 : vector<1x8x8xf32> to vector<2x8x8xf32>
    %84 = arith.addf %82, %83 : vector<2x8x8xf32>
    %85 = math.exp %84 : vector<2x8x8xf32>
    %cst_22 = arith.constant dense<0.000000e+00> : vector<2x8xf32>
    %86 = vector.multi_reduction <add>, %85, %cst_22 [2] : vector<2x8x8xf32> to vector<2x8xf32>
    %87 = vector.shape_cast %86 : vector<2x8xf32> to vector<2x8x1xf32>
    %88 = tpu.reciprocal %87 : vector<2x8x1xf32> -> vector<2x8x1xf32>
    %89 = vector.broadcast %88 : vector<2x8x1xf32> to vector<2x8x8xf32>
    %90 = arith.mulf %85, %89 : vector<2x8x8xf32>
    %91 = arith.truncf %90 : vector<2x8x8xf32> to vector<2x8x8xbf16>
    %92 = vector.extract_strided_slice %30 {offsets = [0, 0, 16], sizes = [2, 8, 16], strides = [1, 1, 1]} : vector<2x8x32xbf16> to vector<2x8x16xbf16>
    "tpu.trace_start"() <{level = 10 : i32, message = "bqk,bkd->bqd"}> : () -> ()
    %cst_23 = arith.constant dense<0.000000e+00> : vector<2x8x16xf32>
    %93 = tpu.matmul %91, %92, %cst_23 {dimension_numbers = #tpu.dot_dimension_numbers<[2], [1], [1], [2], [0, 0, 0, 1, 1, 2], [0], [0]>} : vector<2x8x8xbf16>, vector<2x8x16xbf16>, vector<2x8x16xf32> -> vector<2x8x16xf32>
    "tpu.trace_stop"() : () -> ()
    %94 = tpu.concatenate %64, %93 in 2 : vector<2x8x16xf32>, vector<2x8x16xf32> -> vector<2x8x32xf32>
    %95 = vector.shape_cast %94 : vector<2x8x32xf32> to vector<16x32xf32>
    %c0_24 = arith.constant 0 : index
    %c0_25 = arith.constant 0 : index
    %c0_26 = arith.constant 0 : index
    %96 = vector.load %arg4[%c0_24, %c0_25, %c0_26] : memref<2x32x32xbf16, #tpu.memory_space<vmem>>, vector<1x32x32xbf16>
    %97 = vector.shape_cast %96 : vector<1x32x32xbf16> to vector<32x32xbf16>
    %98 = arith.truncf %95 : vector<16x32xf32> to vector<16x32xbf16>
    %cst_27 = arith.constant dense<0.000000e+00> : vector<16x32xf32>
    %99 = tpu.matmul %98, %97, %cst_27 {dimension_numbers = #tpu.dot_dimension_numbers<[1], [0], [0], [1], [0, 0, 1, 1], [], []>} : vector<16x32xbf16>, vector<32x32xbf16>, vector<16x32xf32> -> vector<16x32xf32>
    %100 = arith.addf %0, %99 : vector<16x32xf32>
    %cst_28 = arith.constant dense<0.000000e+00> : vector<16xf32>
    %101 = vector.multi_reduction <add>, %100, %cst_28 [1] : vector<16x32xf32> to vector<16xf32>
    %102 = vector.shape_cast %101 : vector<16xf32> to vector<16x1xf32>
    %cst_29 = arith.constant 3.200000e+01 : f32
    %103 = vector.broadcast %cst_29 : f32 to vector<16x1xf32>
    %104 = arith.divf %102, %103 : vector<16x1xf32>
    %105 = vector.broadcast %104 : vector<16x1xf32> to vector<16x32xf32>
    %106 = arith.subf %100, %105 : vector<16x32xf32>
    %107 = arith.mulf %106, %106 : vector<16x32xf32>
    %cst_30 = arith.constant dense<0.000000e+00> : vector<16xf32>
    %108 = vector.multi_reduction <add>, %107, %cst_30 [1] : vector<16x32xf32> to vector<16xf32>
    %109 = vector.shape_cast %108 : vector<16xf32> to vector<16x1xf32>
    %cst_31 = arith.constant 3.200000e+01 : f32
    %110 = vector.broadcast %cst_31 : f32 to vector<16x1xf32>
    %111 = arith.divf %109, %110 : vector<16x1xf32>
    %112 = vector.broadcast %104 : vector<16x1xf32> to vector<16x32xf32>
    %113 = arith.subf %100, %112 : vector<16x32xf32>
    %cst_32 = arith.constant 9.99999974E-6 : f32
    %114 = vector.broadcast %cst_32 : f32 to vector<16x1xf32>
    %115 = arith.addf %111, %114 : vector<16x1xf32>
    %116 = math.rsqrt %115 : vector<16x1xf32>
    %117 = vector.broadcast %116 : vector<16x1xf32> to vector<16x32xf32>
    %118 = arith.mulf %113, %117 : vector<16x32xf32>
    %c0_33 = arith.constant 0 : index
    %c0_34 = arith.constant 0 : index
    %c0_35 = arith.constant 0 : index
    %119 = vector.load %arg5[%c0_33, %c0_34, %c0_35] : memref<2x32x64xbf16, #tpu.memory_space<vmem>>, vector<1x32x64xbf16>
    %120 = vector.shape_cast %119 : vector<1x32x64xbf16> to vector<32x64xbf16>
    %121 = arith.truncf %118 : vector<16x32xf32> to vector<16x32xbf16>
    %cst_36 = arith.constant dense<0.000000e+00> : vector<16x64xf32>
    %122 = tpu.matmul %121, %120, %cst_36 {dimension_numbers = #tpu.dot_dimension_numbers<[1], [0], [0], [1], [0, 0, 1, 1], [], []>} : vector<16x32xbf16>, vector<32x64xbf16>, vector<16x64xf32> -> vector<16x64xf32>
    %123 = vector.extract_strided_slice %1 {offsets = [0, 0], sizes = [1, 64], strides = [1, 1]} : vector<8x128xf32> to vector<1x64xf32>
    %124 = vector.broadcast %123 : vector<1x64xf32> to vector<16x64xf32>
    %125 = arith.addf %122, %124 : vector<16x64xf32>
    %cst_37 = arith.constant 0.000000e+00 : f32
    %126 = vector.broadcast %cst_37 : f32 to vector<16x64xf32>
    %127 = arith.maximumf %125, %126 : vector<16x64xf32>
    %c0_38 = arith.constant 0 : index
    %c0_39 = arith.constant 0 : index
    %c0_40 = arith.constant 0 : index
    %128 = vector.load %arg6[%c0_38, %c0_39, %c0_40] : memref<2x64x32xbf16, #tpu.memory_space<vmem>>, vector<1x64x32xbf16>
    %129 = vector.shape_cast %128 : vector<1x64x32xbf16> to vector<64x32xbf16>
    %130 = arith.truncf %127 : vector<16x64xf32> to vector<16x64xbf16>
    %cst_41 = arith.constant dense<0.000000e+00> : vector<16x32xf32>
    %131 = tpu.matmul %130, %129, %cst_41 {dimension_numbers = #tpu.dot_dimension_numbers<[1], [0], [0], [1], [0, 0, 1, 1], [], []>} : vector<16x64xbf16>, vector<64x32xbf16>, vector<16x32xf32> -> vector<16x32xf32>
    %132 = vector.extract_strided_slice %1 {offsets = [0, 64], sizes = [1, 32], strides = [1, 1]} : vector<8x128xf32> to vector<1x32xf32>
    %133 = vector.broadcast %132 : vector<1x32xf32> to vector<16x32xf32>
    %134 = arith.addf %131, %133 : vector<16x32xf32>
    %135 = arith.addf %118, %134 : vector<16x32xf32>
    %cst_42 = arith.constant dense<0.000000e+00> : vector<16xf32>
    %136 = vector.multi_reduction <add>, %135, %cst_42 [1] : vector<16x32xf32> to vector<16xf32>
    %137 = vector.shape_cast %136 : vector<16xf32> to vector<16x1xf32>
    %cst_43 = arith.constant 3.200000e+01 : f32
    %138 = vector.broadcast %cst_43 : f32 to vector<16x1xf32>
    %139 = arith.divf %137, %138 : vector<16x1xf32>
    %140 = vector.broadcast %139 : vector<16x1xf32> to vector<16x32xf32>
    %141 = arith.subf %135, %140 : vector<16x32xf32>
    %142 = arith.mulf %141, %141 : vector<16x32xf32>
    %cst_44 = arith.constant dense<0.000000e+00> : vector<16xf32>
    %143 = vector.multi_reduction <add>, %142, %cst_44 [1] : vector<16x32xf32> to vector<16xf32>
    %144 = vector.shape_cast %143 : vector<16xf32> to vector<16x1xf32>
    %cst_45 = arith.constant 3.200000e+01 : f32
    %145 = vector.broadcast %cst_45 : f32 to vector<16x1xf32>
    %146 = arith.divf %144, %145 : vector<16x1xf32>
    %147 = vector.broadcast %139 : vector<16x1xf32> to vector<16x32xf32>
    %148 = arith.subf %135, %147 : vector<16x32xf32>
    %cst_46 = arith.constant 9.99999974E-6 : f32
    %149 = vector.broadcast %cst_46 : f32 to vector<16x1xf32>
    %150 = arith.addf %146, %149 : vector<16x1xf32>
    %151 = math.rsqrt %150 : vector<16x1xf32>
    %152 = vector.broadcast %151 : vector<16x1xf32> to vector<16x32xf32>
    %153 = arith.mulf %148, %152 : vector<16x32xf32>
    %c0_47 = arith.constant 0 : index
    %c0_48 = arith.constant 0 : index
    %c0_49 = arith.constant 0 : index
    %154 = vector.load %arg9[%c0_47, %c0_48, %c0_49] : memref<2x16x32xf32, #tpu.memory_space<vmem>>, vector<1x16x32xf32>
    %155 = vector.shape_cast %154 : vector<1x16x32xf32> to vector<16x32xf32>
    %156 = vector.shape_cast %153 : vector<16x32xf32> to vector<1x16x32xf32>
    tpu.vector_store %arg9[%c0_47, %c0_48, %c0_49], %156 {strides = array<i32>} : memref<2x16x32xf32, #tpu.memory_space<vmem>>, vector<1x16x32xf32>,
    %c1 = arith.constant 1 : index
    %c0_50 = arith.constant 0 : index
    %c0_51 = arith.constant 0 : index
    %c0_52 = arith.constant 0 : index
    %157 = vector.load %arg3[%c1, %c0_50, %c0_51, %c0_52] : memref<2x3x32x32xbf16, #tpu.memory_space<vmem>>, vector<1x3x32x32xbf16>
    %158 = vector.shape_cast %157 : vector<1x3x32x32xbf16> to vector<3x32x32xbf16>
    %159 = vector.extract_strided_slice %158 {offsets = [0, 0, 0], sizes = [1, 32, 32], strides = [1, 1, 1]} : vector<3x32x32xbf16> to vector<1x32x32xbf16>
    %160 = vector.shape_cast %159 : vector<1x32x32xbf16> to vector<32x32xbf16>
    %161 = arith.truncf %153 : vector<16x32xf32> to vector<16x32xbf16>
    %cst_53 = arith.constant dense<0.000000e+00> : vector<16x32xf32>
    %162 = tpu.matmul %161, %160, %cst_53 {dimension_numbers = #tpu.dot_dimension_numbers<[1], [0], [0], [1], [0, 0, 1, 1], [], []>} : vector<16x32xbf16>, vector<32x32xbf16>, vector<16x32xf32> -> vector<16x32xf32>
    %163 = vector.shape_cast %162 : vector<16x32xf32> to vector<2x8x32xf32>
    %164 = vector.extract_strided_slice %158 {offsets = [1, 0, 0], sizes = [1, 32, 32], strides = [1, 1, 1]} : vector<3x32x32xbf16> to vector<1x32x32xbf16>
    %165 = vector.shape_cast %164 : vector<1x32x32xbf16> to vector<32x32xbf16>
    %166 = arith.truncf %153 : vector<16x32xf32> to vector<16x32xbf16>
    %cst_54 = arith.constant dense<0.000000e+00> : vector<16x32xf32>
    %167 = tpu.matmul %166, %165, %cst_54 {dimension_numbers = #tpu.dot_dimension_numbers<[1], [0], [0], [1], [0, 0, 1, 1], [], []>} : vector<16x32xbf16>, vector<32x32xbf16>, vector<16x32xf32> -> vector<16x32xf32>
    %168 = vector.shape_cast %167 : vector<16x32xf32> to vector<2x8x32xf32>
    %169 = arith.truncf %168 : vector<2x8x32xf32> to vector<2x8x32xbf16>
    %170 = vector.extract_strided_slice %158 {offsets = [2, 0, 0], sizes = [1, 32, 32], strides = [1, 1, 1]} : vector<3x32x32xbf16> to vector<1x32x32xbf16>
    %171 = vector.shape_cast %170 : vector<1x32x32xbf16> to vector<32x32xbf16>
    %172 = arith.truncf %153 : vector<16x32xf32> to vector<16x32xbf16>
    %cst_55 = arith.constant dense<0.000000e+00> : vector<16x32xf32>
    %173 = tpu.matmul %172, %171, %cst_55 {dimension_numbers = #tpu.dot_dimension_numbers<[1], [0], [0], [1], [0, 0, 1, 1], [], []>} : vector<16x32xbf16>, vector<32x32xbf16>, vector<16x32xf32> -> vector<16x32xf32>
    %174 = vector.shape_cast %173 : vector<16x32xf32> to vector<2x8x32xf32>
    %175 = arith.truncf %174 : vector<2x8x32xf32> to vector<2x8x32xbf16>
    %c1_56 = arith.constant 1 : index
    %c0_57 = arith.constant 0 : index
    %c0_58 = arith.constant 0 : index
    %176 = vector.load %arg2[%c1_56, %c0_57, %c0_58] : memref<2x8x32xbf16, #tpu.memory_space<vmem>>, vector<1x8x32xbf16>
    %177 = vector.shape_cast %176 : vector<1x8x32xbf16> to vector<8x32xbf16>
    %178 = vector.shape_cast %177 : vector<8x32xbf16> to vector<1x8x32xbf16>
    %179 = vector.shape_cast %178 : vector<1x8x32xbf16> to vector<1x8x32xbf16>
    %180 = vector.broadcast %179 : vector<1x8x32xbf16> to vector<2x8x32xbf16>
    %181 = vector.extract_strided_slice %163 {offsets = [0, 0, 0], sizes = [2, 8, 16], strides = [1, 1, 1]} : vector<2x8x32xf32> to vector<2x8x16xf32>
    %182 = vector.extract_strided_slice %9 {offsets = [0, 0], sizes = [1, 16], strides = [1, 1]} : vector<1x128xf32> to vector<1x16xf32>
    %183 = vector.shape_cast %182 : vector<1x16xf32> to vector<1x1x16xf32>
    %184 = vector.broadcast %183 : vector<1x1x16xf32> to vector<2x8x16xf32>
    %185 = arith.addf %181, %184 : vector<2x8x16xf32>
    %186 = arith.truncf %185 : vector<2x8x16xf32> to vector<2x8x16xbf16>
    %187 = vector.extract_strided_slice %10 {offsets = [0, 0], sizes = [1, 16], strides = [1, 1]} : vector<1x128xf32> to vector<1x16xf32>
    %188 = vector.shape_cast %187 : vector<1x16xf32> to vector<1x1x16xf32>
    %189 = vector.broadcast %188 : vector<1x1x16xf32> to vector<2x8x16xf32>
    %190 = arith.addf %181, %189 : vector<2x8x16xf32>
    %191 = arith.truncf %190 : vector<2x8x16xf32> to vector<2x8x16xbf16>
    %192 = vector.extract_strided_slice %169 {offsets = [0, 0, 0], sizes = [2, 8, 16], strides = [1, 1, 1]} : vector<2x8x32xbf16> to vector<2x8x16xbf16>
    "tpu.trace_start"() <{level = 10 : i32, message = "bqd,bkd->bqk"}> : () -> ()
    %cst_59 = arith.constant dense<0.000000e+00> : vector<2x8x8xf32>
    %193 = tpu.matmul %186, %192, %cst_59 {dimension_numbers = #tpu.dot_dimension_numbers<[2], [2], [1], [1], [0, 0, 0, 1, 1, 1], [0], [0]>} : vector<2x8x16xbf16>, vector<2x8x16xbf16>, vector<2x8x8xf32> -> vector<2x8x8xf32>
    "tpu.trace_stop"() : () -> ()
    %194 = vector.extract_strided_slice %180 {offsets = [0, 0, 0], sizes = [2, 8, 16], strides = [1, 1, 1]} : vector<2x8x32xbf16> to vector<2x8x16xbf16>
    "tpu.trace_start"() <{level = 10 : i32, message = "bqd,bkd->bqk"}> : () -> ()
    %cst_60 = arith.constant dense<0.000000e+00> : vector<2x8x8xf32>
    %195 = tpu.matmul %191, %194, %cst_60 {dimension_numbers = #tpu.dot_dimension_numbers<[2], [2], [1], [1], [0, 0, 0, 1, 1, 1], [0], [0]>} : vector<2x8x16xbf16>, vector<2x8x16xbf16>, vector<2x8x8xf32> -> vector<2x8x8xf32>
    "tpu.trace_stop"() : () -> ()
    %196 = arith.addf %193, %195 : vector<2x8x8xf32>
    %cst_61 = arith.constant 2.500000e-01 : f32
    %197 = vector.broadcast %cst_61 : f32 to vector<2x8x8xf32>
    %198 = arith.mulf %196, %197 : vector<2x8x8xf32>
    %199 = vector.broadcast %8 : vector<1x8x8xf32> to vector<2x8x8xf32>
    %200 = arith.addf %198, %199 : vector<2x8x8xf32>
    %201 = math.exp %200 : vector<2x8x8xf32>
    %cst_62 = arith.constant dense<0.000000e+00> : vector<2x8xf32>
    %202 = vector.multi_reduction <add>, %201, %cst_62 [2] : vector<2x8x8xf32> to vector<2x8xf32>
    %203 = vector.shape_cast %202 : vector<2x8xf32> to vector<2x8x1xf32>
    %204 = tpu.reciprocal %203 : vector<2x8x1xf32> -> vector<2x8x1xf32>
    %205 = vector.broadcast %204 : vector<2x8x1xf32> to vector<2x8x8xf32>
    %206 = arith.mulf %201, %205 : vector<2x8x8xf32>
    %207 = arith.truncf %206 : vector<2x8x8xf32> to vector<2x8x8xbf16>
    %208 = vector.extract_strided_slice %175 {offsets = [0, 0, 0], sizes = [2, 8, 16], strides = [1, 1, 1]} : vector<2x8x32xbf16> to vector<2x8x16xbf16>
    "tpu.trace_start"() <{level = 10 : i32, message = "bqk,bkd->bqd"}> : () -> ()
    %cst_63 = arith.constant dense<0.000000e+00> : vector<2x8x16xf32>
    %209 = tpu.matmul %207, %208, %cst_63 {dimension_numbers = #tpu.dot_dimension_numbers<[2], [1], [1], [2], [0, 0, 0, 1, 1, 2], [0], [0]>} : vector<2x8x8xbf16>, vector<2x8x16xbf16>, vector<2x8x16xf32> -> vector<2x8x16xf32>
    "tpu.trace_stop"() : () -> ()
    %210 = vector.extract_strided_slice %163 {offsets = [0, 0, 16], sizes = [2, 8, 16], strides = [1, 1, 1]} : vector<2x8x32xf32> to vector<2x8x16xf32>
    %211 = vector.extract_strided_slice %9 {offsets = [0, 16], sizes = [1, 16], strides = [1, 1]} : vector<1x128xf32> to vector<1x16xf32>
    %212 = vector.shape_cast %211 : vector<1x16xf32> to vector<1x1x16xf32>
    %213 = vector.broadcast %212 : vector<1x1x16xf32> to vector<2x8x16xf32>
    %214 = arith.addf %210, %213 : vector<2x8x16xf32>
    %215 = arith.truncf %214 : vector<2x8x16xf32> to vector<2x8x16xbf16>
    %216 = vector.extract_strided_slice %10 {offsets = [0, 16], sizes = [1, 16], strides = [1, 1]} : vector<1x128xf32> to vector<1x16xf32>
    %217 = vector.shape_cast %216 : vector<1x16xf32> to vector<1x1x16xf32>
    %218 = vector.broadcast %217 : vector<1x1x16xf32> to vector<2x8x16xf32>
    %219 = arith.addf %210, %218 : vector<2x8x16xf32>
    %220 = arith.truncf %219 : vector<2x8x16xf32> to vector<2x8x16xbf16>
    %221 = vector.extract_strided_slice %169 {offsets = [0, 0, 16], sizes = [2, 8, 16], strides = [1, 1, 1]} : vector<2x8x32xbf16> to vector<2x8x16xbf16>
    "tpu.trace_start"() <{level = 10 : i32, message = "bqd,bkd->bqk"}> : () -> ()
    %cst_64 = arith.constant dense<0.000000e+00> : vector<2x8x8xf32>
    %222 = tpu.matmul %215, %221, %cst_64 {dimension_numbers = #tpu.dot_dimension_numbers<[2], [2], [1], [1], [0, 0, 0, 1, 1, 1], [0], [0]>} : vector<2x8x16xbf16>, vector<2x8x16xbf16>, vector<2x8x8xf32> -> vector<2x8x8xf32>
    "tpu.trace_stop"() : () -> ()
    %223 = vector.extract_strided_slice %180 {offsets = [0, 0, 16], sizes = [2, 8, 16], strides = [1, 1, 1]} : vector<2x8x32xbf16> to vector<2x8x16xbf16>
    "tpu.trace_start"() <{level = 10 : i32, message = "bqd,bkd->bqk"}> : () -> ()
    %cst_65 = arith.constant dense<0.000000e+00> : vector<2x8x8xf32>
    %224 = tpu.matmul %220, %223, %cst_65 {dimension_numbers = #tpu.dot_dimension_numbers<[2], [2], [1], [1], [0, 0, 0, 1, 1, 1], [0], [0]>} : vector<2x8x16xbf16>, vector<2x8x16xbf16>, vector<2x8x8xf32> -> vector<2x8x8xf32>
    "tpu.trace_stop"() : () -> ()
    %225 = arith.addf %222, %224 : vector<2x8x8xf32>
    %cst_66 = arith.constant 2.500000e-01 : f32
    %226 = vector.broadcast %cst_66 : f32 to vector<2x8x8xf32>
    %227 = arith.mulf %225, %226 : vector<2x8x8xf32>
    %228 = vector.broadcast %8 : vector<1x8x8xf32> to vector<2x8x8xf32>
    %229 = arith.addf %227, %228 : vector<2x8x8xf32>
    %230 = math.exp %229 : vector<2x8x8xf32>
    %cst_67 = arith.constant dense<0.000000e+00> : vector<2x8xf32>
    %231 = vector.multi_reduction <add>, %230, %cst_67 [2] : vector<2x8x8xf32> to vector<2x8xf32>
    %232 = vector.shape_cast %231 : vector<2x8xf32> to vector<2x8x1xf32>
    %233 = tpu.reciprocal %232 : vector<2x8x1xf32> -> vector<2x8x1xf32>
    %234 = vector.broadcast %233 : vector<2x8x1xf32> to vector<2x8x8xf32>
    %235 = arith.mulf %230, %234 : vector<2x8x8xf32>
    %236 = arith.truncf %235 : vector<2x8x8xf32> to vector<2x8x8xbf16>
    %237 = vector.extract_strided_slice %175 {offsets = [0, 0, 16], sizes = [2, 8, 16], strides = [1, 1, 1]} : vector<2x8x32xbf16> to vector<2x8x16xbf16>
    "tpu.trace_start"() <{level = 10 : i32, message = "bqk,bkd->bqd"}> : () -> ()
    %cst_68 = arith.constant dense<0.000000e+00> : vector<2x8x16xf32>
    %238 = tpu.matmul %236, %237, %cst_68 {dimension_numbers = #tpu.dot_dimension_numbers<[2], [1], [1], [2], [0, 0, 0, 1, 1, 2], [0], [0]>} : vector<2x8x8xbf16>, vector<2x8x16xbf16>, vector<2x8x16xf32> -> vector<2x8x16xf32>
    "tpu.trace_stop"() : () -> ()
    %239 = tpu.concatenate %209, %238 in 2 : vector<2x8x16xf32>, vector<2x8x16xf32> -> vector<2x8x32xf32>
    %240 = vector.shape_cast %239 : vector<2x8x32xf32> to vector<16x32xf32>
    %c1_69 = arith.constant 1 : index
    %c0_70 = arith.constant 0 : index
    %c0_71 = arith.constant 0 : index
    %241 = vector.load %arg4[%c1_69, %c0_70, %c0_71] : memref<2x32x32xbf16, #tpu.memory_space<vmem>>, vector<1x32x32xbf16>
    %242 = vector.shape_cast %241 : vector<1x32x32xbf16> to vector<32x32xbf16>
    %243 = arith.truncf %240 : vector<16x32xf32> to vector<16x32xbf16>
    %cst_72 = arith.constant dense<0.000000e+00> : vector<16x32xf32>
    %244 = tpu.matmul %243, %242, %cst_72 {dimension_numbers = #tpu.dot_dimension_numbers<[1], [0], [0], [1], [0, 0, 1, 1], [], []>} : vector<16x32xbf16>, vector<32x32xbf16>, vector<16x32xf32> -> vector<16x32xf32>
    %245 = arith.addf %153, %244 : vector<16x32xf32>
    %cst_73 = arith.constant dense<0.000000e+00> : vector<16xf32>
    %246 = vector.multi_reduction <add>, %245, %cst_73 [1] : vector<16x32xf32> to vector<16xf32>
    %247 = vector.shape_cast %246 : vector<16xf32> to vector<16x1xf32>
    %cst_74 = arith.constant 3.200000e+01 : f32
    %248 = vector.broadcast %cst_74 : f32 to vector<16x1xf32>
    %249 = arith.divf %247, %248 : vector<16x1xf32>
    %250 = vector.broadcast %249 : vector<16x1xf32> to vector<16x32xf32>
    %251 = arith.subf %245, %250 : vector<16x32xf32>
    %252 = arith.mulf %251, %251 : vector<16x32xf32>
    %cst_75 = arith.constant dense<0.000000e+00> : vector<16xf32>
    %253 = vector.multi_reduction <add>, %252, %cst_75 [1] : vector<16x32xf32> to vector<16xf32>
    %254 = vector.shape_cast %253 : vector<16xf32> to vector<16x1xf32>
    %cst_76 = arith.constant 3.200000e+01 : f32
    %255 = vector.broadcast %cst_76 : f32 to vector<16x1xf32>
    %256 = arith.divf %254, %255 : vector<16x1xf32>
    %257 = vector.broadcast %249 : vector<16x1xf32> to vector<16x32xf32>
    %258 = arith.subf %245, %257 : vector<16x32xf32>
    %cst_77 = arith.constant 9.99999974E-6 : f32
    %259 = vector.broadcast %cst_77 : f32 to vector<16x1xf32>
    %260 = arith.addf %256, %259 : vector<16x1xf32>
    %261 = math.rsqrt %260 : vector<16x1xf32>
    %262 = vector.broadcast %261 : vector<16x1xf32> to vector<16x32xf32>
    %263 = arith.mulf %258, %262 : vector<16x32xf32>
    %c1_78 = arith.constant 1 : index
    %c0_79 = arith.constant 0 : index
    %c0_80 = arith.constant 0 : index
    %264 = vector.load %arg5[%c1_78, %c0_79, %c0_80] : memref<2x32x64xbf16, #tpu.memory_space<vmem>>, vector<1x32x64xbf16>
    %265 = vector.shape_cast %264 : vector<1x32x64xbf16> to vector<32x64xbf16>
    %266 = arith.truncf %263 : vector<16x32xf32> to vector<16x32xbf16>
    %cst_81 = arith.constant dense<0.000000e+00> : vector<16x64xf32>
    %267 = tpu.matmul %266, %265, %cst_81 {dimension_numbers = #tpu.dot_dimension_numbers<[1], [0], [0], [1], [0, 0, 1, 1], [], []>} : vector<16x32xbf16>, vector<32x64xbf16>, vector<16x64xf32> -> vector<16x64xf32>
    %268 = vector.extract_strided_slice %1 {offsets = [1, 0], sizes = [1, 64], strides = [1, 1]} : vector<8x128xf32> to vector<1x64xf32>
    %269 = vector.broadcast %268 : vector<1x64xf32> to vector<16x64xf32>
    %270 = arith.addf %267, %269 : vector<16x64xf32>
    %cst_82 = arith.constant 0.000000e+00 : f32
    %271 = vector.broadcast %cst_82 : f32 to vector<16x64xf32>
    %272 = arith.maximumf %270, %271 : vector<16x64xf32>
    %c1_83 = arith.constant 1 : index
    %c0_84 = arith.constant 0 : index
    %c0_85 = arith.constant 0 : index
    %273 = vector.load %arg6[%c1_83, %c0_84, %c0_85] : memref<2x64x32xbf16, #tpu.memory_space<vmem>>, vector<1x64x32xbf16>
    %274 = vector.shape_cast %273 : vector<1x64x32xbf16> to vector<64x32xbf16>
    %275 = arith.truncf %272 : vector<16x64xf32> to vector<16x64xbf16>
    %cst_86 = arith.constant dense<0.000000e+00> : vector<16x32xf32>
    %276 = tpu.matmul %275, %274, %cst_86 {dimension_numbers = #tpu.dot_dimension_numbers<[1], [0], [0], [1], [0, 0, 1, 1], [], []>} : vector<16x64xbf16>, vector<64x32xbf16>, vector<16x32xf32> -> vector<16x32xf32>
    %277 = vector.extract_strided_slice %1 {offsets = [1, 64], sizes = [1, 32], strides = [1, 1]} : vector<8x128xf32> to vector<1x32xf32>
    %278 = vector.broadcast %277 : vector<1x32xf32> to vector<16x32xf32>
    %279 = arith.addf %276, %278 : vector<16x32xf32>
    %280 = arith.addf %263, %279 : vector<16x32xf32>
    %cst_87 = arith.constant dense<0.000000e+00> : vector<16xf32>
    %281 = vector.multi_reduction <add>, %280, %cst_87 [1] : vector<16x32xf32> to vector<16xf32>
    %282 = vector.shape_cast %281 : vector<16xf32> to vector<16x1xf32>
    %cst_88 = arith.constant 3.200000e+01 : f32
    %283 = vector.broadcast %cst_88 : f32 to vector<16x1xf32>
    %284 = arith.divf %282, %283 : vector<16x1xf32>
    %285 = vector.broadcast %284 : vector<16x1xf32> to vector<16x32xf32>
    %286 = arith.subf %280, %285 : vector<16x32xf32>
    %287 = arith.mulf %286, %286 : vector<16x32xf32>
    %cst_89 = arith.constant dense<0.000000e+00> : vector<16xf32>
    %288 = vector.multi_reduction <add>, %287, %cst_89 [1] : vector<16x32xf32> to vector<16xf32>
    %289 = vector.shape_cast %288 : vector<16xf32> to vector<16x1xf32>
    %cst_90 = arith.constant 3.200000e+01 : f32
    %290 = vector.broadcast %cst_90 : f32 to vector<16x1xf32>
    %291 = arith.divf %289, %290 : vector<16x1xf32>
    %292 = vector.broadcast %284 : vector<16x1xf32> to vector<16x32xf32>
    %293 = arith.subf %280, %292 : vector<16x32xf32>
    %cst_91 = arith.constant 9.99999974E-6 : f32
    %294 = vector.broadcast %cst_91 : f32 to vector<16x1xf32>
    %295 = arith.addf %291, %294 : vector<16x1xf32>
    %296 = math.rsqrt %295 : vector<16x1xf32>
    %297 = vector.broadcast %296 : vector<16x1xf32> to vector<16x32xf32>
    %298 = arith.mulf %293, %297 : vector<16x32xf32>
    %c1_92 = arith.constant 1 : index
    %c0_93 = arith.constant 0 : index
    %c0_94 = arith.constant 0 : index
    %299 = vector.load %arg9[%c1_92, %c0_93, %c0_94] : memref<2x16x32xf32, #tpu.memory_space<vmem>>, vector<1x16x32xf32>
    %300 = vector.shape_cast %299 : vector<1x16x32xf32> to vector<16x32xf32>
    %301 = vector.shape_cast %298 : vector<16x32xf32> to vector<1x16x32xf32>
    tpu.vector_store %arg9[%c1_92, %c0_93, %c0_94], %301 {strides = array<i32>} : memref<2x16x32xf32, #tpu.memory_space<vmem>>, vector<1x16x32xf32>,
    %c0_95 = arith.constant 0 : index
    %c0_96 = arith.constant 0 : index
    %302 = vector.load %arg7[%c0_95, %c0_96] : memref<32x128xbf16, #tpu.memory_space<vmem>>, vector<32x128xbf16>
    %303 = arith.truncf %298 : vector<16x32xf32> to vector<16x32xbf16>
    %cst_97 = arith.constant dense<0.000000e+00> : vector<16x128xf32>
    %304 = tpu.matmul %303, %302, %cst_97 {dimension_numbers = #tpu.dot_dimension_numbers<[1], [0], [0], [1], [0, 0, 1, 1], [], []>} : vector<16x32xbf16>, vector<32x128xbf16>, vector<16x128xf32> -> vector<16x128xf32>
    %305 = vector.broadcast %11 : vector<1x128xf32> to vector<16x128xf32>
    %306 = arith.addf %304, %305 : vector<16x128xf32>
    %c0_98 = arith.constant 0 : index
    %c0_99 = arith.constant 0 : index
    %307 = vector.load %arg10[%c0_98, %c0_99] : memref<16x128xf32, #tpu.memory_space<vmem>>, vector<16x128xf32>
    tpu.vector_store %arg10[%c0_98, %c0_99], %306 {strides = array<i32>} : memref<16x128xf32, #tpu.memory_space<vmem>>, vector<16x128xf32>,
    return
  }
  func.func @transform_0(%arg0: i32) -> (i32, i32) {
    %c0_i32 = arith.constant 0 : i32
    %c0_i32_0 = arith.constant 0 : i32
    return %arg0, %c0_i32 : i32, i32
  }
  func.func @transform_1(%arg0: i32) -> (i32, i32, i32) {
    %c0_i32 = arith.constant 0 : i32
    %c0_i32_0 = arith.constant 0 : i32
    %c0_i32_1 = arith.constant 0 : i32
    %c0_i32_2 = arith.constant 0 : i32
    return %c0_i32, %c0_i32_0, %c0_i32_1 : i32, i32, i32
  }
  func.func @transform_2(%arg0: i32) -> (i32, i32, i32, i32) {
    %c0_i32 = arith.constant 0 : i32
    %c0_i32_0 = arith.constant 0 : i32
    %c0_i32_1 = arith.constant 0 : i32
    %c0_i32_2 = arith.constant 0 : i32
    %c0_i32_3 = arith.constant 0 : i32
    return %c0_i32, %c0_i32_0, %c0_i32_1, %c0_i32_2 : i32, i32, i32, i32
  }
  func.func @transform_3(%arg0: i32) -> (i32, i32, i32) {
    %c0_i32 = arith.constant 0 : i32
    %c0_i32_0 = arith.constant 0 : i32
    %c0_i32_1 = arith.constant 0 : i32
    %c0_i32_2 = arith.constant 0 : i32
    return %c0_i32, %c0_i32_0, %c0_i32_1 : i32, i32, i32
  }
  func.func @transform_4(%arg0: i32) -> (i32, i32, i32) {
    %c0_i32 = arith.constant 0 : i32
    %c0_i32_0 = arith.constant 0 : i32
    %c0_i32_1 = arith.constant 0 : i32
    %c0_i32_2 = arith.constant 0 : i32
    return %c0_i32, %c0_i32_0, %c0_i32_1 : i32, i32, i32
  }
  func.func @transform_5(%arg0: i32) -> (i32, i32, i32) {
    %c0_i32 = arith.constant 0 : i32
    %c0_i32_0 = arith.constant 0 : i32
    %c0_i32_1 = arith.constant 0 : i32
    %c0_i32_2 = arith.constant 0 : i32
    return %c0_i32, %c0_i32_0, %c0_i32_1 : i32, i32, i32
  }
  func.func @transform_6(%arg0: i32) -> (i32, i32) {
    %c0_i32 = arith.constant 0 : i32
    %c0_i32_0 = arith.constant 0 : i32
    %c0_i32_1 = arith.constant 0 : i32
    return %c0_i32, %c0_i32_0 : i32, i32
  }
  func.func @transform_7(%arg0: i32) -> (i32, i32) {
    %c0_i32 = arith.constant 0 : i32
    %c0_i32_0 = arith.constant 0 : i32
    %c0_i32_1 = arith.constant 0 : i32
    return %c0_i32, %c0_i32_0 : i32, i32
  }
  func.func @transform_8(%arg0: i32) -> (i32, i32, i32) {
    %c0_i32 = arith.constant 0 : i32
    %c0_i32_0 = arith.constant 0 : i32
    %c0_i32_1 = arith.constant 0 : i32
    return %c0_i32, %arg0, %c0_i32_0 : i32, i32, i32
  }
  func.func @transform_9(%arg0: i32) -> (i32, i32) {
    %c0_i32 = arith.constant 0 : i32
    %c0_i32_0 = arith.constant 0 : i32
    return %arg0, %c0_i32 : i32, i32
  }
}

</mosaic_0001>

<bundles_post_ra>
// kernel: tpu_custom_call.1
= control target key start
LH: loop header
LB: loop body
LE: loop exit
PB: predicated region body
PF: predicated region fallthrough
CT: control target
= control target key end

     0   :  { %15 = vsyncpa [#allocation3], 0  ;;  %s3658_s0 = inlined_call_operand.hbm [shape: f32[16,32], index: 0, kind: input, shape index: {}]   ;;  %s3659_s1 = inlined_call_operand.hbm [shape: bf16[2,8,32], index: 1, kind: input, shape index: {}]   ;;  %s3660_s2 = inlined_call_operand.vmem [shape: bf16[2,3,32,32], index: 2, kind: input, shape index: {}]   ;;  %s3661_s3 = inlined_call_operand.hbm [shape: bf16[2,32,32], index: 3, kind: input, shape index: {}]   ;;  %s3662_s4 = inlined_call_operand.hbm [shape: bf16[2,32,64], index: 4, kind: input, shape index: {}]   ;;  %s3663_s5 = inlined_call_operand.vmem [shape: bf16[2,64,32], index: 5, kind: input, shape index: {}]   ;;  %s3664_s6 = inlined_call_operand.vmem [shape: bf16[32,128], index: 6, kind: input, shape index: {}]   ;;  %s3665_s7 = inlined_call_operand.vmem [shape: f32[8,128], index: 7, kind: input, shape index: {}]   ;;  %s3666_s8 = inlined_call_operand.hbm [shape: f32[2,16,32], index: 8, kind: output, shape index: {0}]   ;;  %s3667_s9 = inlined_call_operand.hbm [shape: f32[16,128], index: 9, kind: output, shape index: {1}]  }
   0x1   :  { %16 = vsyncpa [#allocation6], 0 }
   0x2   :  { %17 = vsyncpa [#allocation9], 0 }
   0x3   :  { %18 = vsyncpa [#allocation4], 0 }
   0x4   :  { %19 = vsyncpa [#allocation12], 0  ;;  %s3095_s30 = smov [#allocation5]   ;;  %s2953_s13 = scalar_lea.hbm %s3659_s1, 128 }
   0x5   :  { %s37_s10 = sshll.u32 %s3095_s30, 4  ;;  %p2954_p0 = scmp.ne.s32.totalorder %s3659_s1, %s2953_s13  ;;  %s38_s10 = int_to_ptr.vmem [resolvable:$true] %s37_s10 }
   0x6   :  { %p2957_p1 = scmp.lt.u32.totalorder %s2953_s13, %s3659_s1 }
   0x8   :  { %p2959_p2 = pnand %p2957_p1, %p2954_p0 }
   0xa   :  { %2962 = shalt.err (!%p2959_p2)
}
   0xb   :  { %s2963_s18 = scalar_lea.vmem %s38_s10, 128  ;;  %p2968_p4 = scmp.lt.s32.totalorder %s38_s10, %s38_s10 }
   0xc   :  { %p2964_p3 = scmp.ne.s32.totalorder %s38_s10, %s2963_s18  ;;  %p2969_p5 = scmp.lt.s32.totalorder %s2963_s18, %s2963_s18 }
   0xe   :  { %p2970_p6 = por %p2969_p5, %p2968_p4 }
  0x10   :  { %p2971_p7 = pnand %p2970_p6, %p2964_p3 }
  0x12   :  { %2974 = shalt.err (!%p2971_p7)
}
  0x13   :  { %s3096_s19 = smov 64   ;;  %s3097_s20 = smov 4  }
  0x14   :  { %43 = dma.hbm_to_vmem [thread:$0]  %s3659_s1, 128, %s38_s10, [#allocation6], %s3096_s19, %s3096_s19, %s3097_s20  }
  0x15   :  { %s3098_s23 = smov [#allocation2]   ;;  %s2975_s27 = scalar_lea.hbm %s3658_s0, 256 }
  0x16   :  { %s25_s24 = sshll.u32 %s3098_s23, 4  ;;  %p2976_p8 = scmp.ne.s32.totalorder %s3658_s0, %s2975_s27  ;;  %s26_s24 = int_to_ptr.vmem [resolvable:$true] %s25_s24 }
  0x17   :  { %p2979_p9 = scmp.lt.u32.totalorder %s2975_s27, %s3658_s0 }
  0x19   :  { %p2981_p10 = pnand %p2979_p9, %p2976_p8 }
  0x1b   :  { %2984 = shalt.err (!%p2981_p10)
}
  0x1c   :  { %s2985_s12 = scalar_lea.vmem %s26_s24, 256  ;;  %p2990_p12 = scmp.lt.s32.totalorder %s26_s24, %s26_s24 }
  0x1d   :  { %p2986_p11 = scmp.ne.s32.totalorder %s26_s24, %s2985_s12  ;;  %p2991_p13 = scmp.lt.s32.totalorder %s2985_s12, %s2985_s12 }
  0x1f   :  { %p2992_p0 = por %p2991_p13, %p2990_p12 }
  0x21   :  { %p2993_p1 = pnand %p2992_p0, %p2986_p11 }
  0x23   :  { %2996 = shalt.err (!%p2993_p1)
}
  0x24   :  { %s3099_s1 = smov 128   ;;  %s3100_s10 = smov 8  }
  0x25   :  { %31 = dma.hbm_to_vmem [thread:$0]  %s3658_s0, 256, %s26_s24, [#allocation3], %s3099_s1, %s3099_s1, %s3100_s10  }
  0x26   :  { %s3101_s15 = smov [#allocation7]   ;;  %s3102_s17 = smov [#allocation8]  }
  0x27   :  { %s51_s16 = sshll.u32 %s3101_s15, 4  ;;  %s63_s18 = sshll.u32 %s3102_s17, 4  ;;  %s52_s16 = int_to_ptr.vmem [resolvable:$true] %s51_s16  ;;  %s3189_s18 = int_to_ptr.vmem [resolvable:$true] %s63_s18 }
  0x28   :  { %s2997_s23 = scalar_lea.hbm %s3661_s3, 512 }
  0x29   :  { %p2998_p2 = scmp.ne.s32.totalorder %s3661_s3, %s2997_s23  ;;  %p3001_p3 = scmp.lt.u32.totalorder %s2997_s23, %s3661_s3 }
  0x2b   :  { %p3003_p4 = pnand %p3001_p3, %p2998_p2 }
  0x2d   :  { %3006 = shalt.err (!%p3003_p4)
}
  0x2e   :  { %s3007_s0 = scalar_lea.vmem %s52_s16, 512  ;;  %p3012_p6 = scmp.lt.s32.totalorder %s52_s16, %s52_s16 }
  0x2f   :  { %p3008_p5 = scmp.ne.s32.totalorder %s52_s16, %s3007_s0  ;;  %p3013_p7 = scmp.lt.s32.totalorder %s3007_s0, %s3007_s0 }
  0x31   :  { %p3014_p8 = por %p3013_p7, %p3012_p6 }
  0x33   :  { %p3015_p9 = pnand %p3014_p8, %p3008_p5 }
  0x35   :  { %3018 = shalt.err (!%p3015_p9)
}
  0x36   :  { %57 = dma.hbm_to_vmem [thread:$0]  %s3661_s3, 512, %s52_s16, [#allocation6], %s3096_s19, %s3096_s19, %s3097_s20  }
  0x37   :  { %s3019_s12 = scalar_lea.hbm %s3662_s4, 512 }
  0x38   :  { %p3020_p10 = scmp.ne.s32.totalorder %s3662_s4, %s3019_s12  ;;  %p3023_p11 = scmp.lt.u32.totalorder %s3019_s12, %s3662_s4 }
  0x3a   :  { %p3025_p12 = pnand %p3023_p11, %p3020_p10 }
  0x3c   :  { %3028 = shalt.err (!%p3025_p12)
}
  0x3d   :  { %s3029_s21 = scalar_lea.vmem %s3189_s18, 512  ;;  %p3034_p0 = scmp.lt.s32.totalorder %s3189_s18, %s3189_s18 }
  0x3e   :  { %p3030_p13 = scmp.ne.s32.totalorder %s3189_s18, %s3029_s21  ;;  %p3035_p1 = scmp.lt.s32.totalorder %s3029_s21, %s3029_s21 }
  0x40   :  { %p3036_p2 = por %p3035_p1, %p3034_p0 }
  0x42   :  { %p3037_p3 = pnand %p3036_p2, %p3030_p13 }
  0x44   :  { %3040 = shalt.err (!%p3037_p3)
}
  0x45   :  { %69 = dma.hbm_to_vmem [thread:$0]  %s3662_s4, 512, %s3189_s18, [#allocation9], %s3096_s19, %s3096_s19, %s3097_s20  }
  0x46   :  { %3085 = dma.done.wait [#allocation3], 256  }
  0x47   :  { %3086 = vsyncadd [#allocation3], 4294967040 }
  0x48   :  { %3087 = dma.done.wait [#allocation6], 640  }
  0x49   :  { %3088 = vsyncadd [#allocation6], 4294966656 }
  0x4a   :  { %3089 = dma.done.wait [#allocation9], 512  }
  0x4b   :  { %3090 = vsyncadd [#allocation9], 4294966784  ;;  %v3103_v0 = vmov 0.0   ;;  %vm3104_vm0 = vmmov 0   ;;  %v2872_v1 = vld [vmem:[%s3660_s2] sm:$0xff]   ;;  %v2873_v2 = vld [vmem:[%s3660_s2 + $0x10] sm:$0xff]   ;;  %v92_v13 = vlaneseq }
  0x4c   :  { %2560 = vmatprep.subr.bf16.mxu0 %v3103_v0  ;;  %2568 = vmatprep.subr.bf16.mxu1 %v3103_v0  ;;  %v2874_v3 = vld [vmem:[%s3660_s2 + $0x8] sm:$0xff]   ;;  %v3242_v4 = vld [vmem:[#allocation2] sm:$0xff]  ;;  %v2875_v6 = vld [vmem:[%s3660_s2 + $0x18] sm:$0xff]   ;;  %vm295_vm1 = vcmask 130048   ;;  %vm123_vm2 = vcmask 261120   ;;  %s3105_s30 = smov 112  }
  0x4d   :  { %2564 = vmatprep.mubr.msk.bf16.mxu0 %vm3104_vm0, %v3103_v0  ;;  %2572 = vmatprep.mubr.msk.bf16.mxu1 %vm3104_vm0, %v3103_v0  ;;  %v3244_v5 = vld [vmem:[#allocation2 + $0x8] sm:$0xff]  ;;  %v2876_v8 = vld [vmem:[%s3660_s2 + $0x20] sm:$0xff]   ;;  %v278_v9 = vld [vmem:[#allocation5] sm:$0xf]  ;;  %v3275_v14 = vshrl.u32 %v92_v13, 7  ;;  %vm501_vm3 = vcmask 1043456  }
  0x4e   :  { %2561 = vmatpush3.bf16.msra.mxu0 %v2872_v1  ;;  %2569 = vmatpush3.bf16.msra.mxu1 %v2873_v2  ;;  %v110_v7 = vpack.c.bf16 %v3244_v5, %v3242_v4  ;;  %v300_v10 = vsel %vm295_vm1, %v278_v9, 0  ;;  %v2877_v11 = vld [vmem:[%s3660_s2 + $0x28] sm:$0xff]   ;;  %v2395_v12 = vcombine.low %v278_v9, %v278_v9  ;;  %v3281_v16 = vld [vmem:[%s3665_s7] sm:$0xff]  ;;  %v95_v48 = vand.u32 127, %v92_v13  ;;  %s3106_s13 = smov 16  }
  0x4f   :  { %2562 = vmatprep.subr.bf16.mxu0 %v3103_v0  ;;  %2570 = vmatprep.subr.bf16.mxu1 %v3103_v0  ;;  %v289_v15 = vsub.s32 4, %v3275_v14  ;;  %v281_v25 = vsub.s32 3, %v3275_v14  ;;  %vm485_vm5 = vcmask 64512   ;;  %vm1117_vm6 = vcmask 523264  }
  0x50   :  { %597 = vrot.lane.b32.xlu1 %v2395_v12, %s3105_s30  ;;  %vm96_vm4 = vcmp.gt.s32.totalorder %v95_v48, %v3275_v14 }
  0x51   :  { %v3284_v17 = vrot.slane %v3281_v16, %v289_v15  ;;  %v3296_v35 = vrot.slane %v3281_v16, %v281_v25  ;;  %v3327_v49 = vsel %vm96_vm4, -1e+30, %v3103_v0 }
  0x52   :  { %2563 = vmatpush3.bf16.msra.mxu0 %v2874_v3  ;;  %2571 = vmatpush3.bf16.msra.mxu1 %v2875_v6 }
  0x53   :  { %2576 = vmatprep.subr.bf16.mxu0 %v3103_v0  ;;  %2584 = vmatprep.subr.bf16.mxu1 %v3103_v0 }
  0x55   :  { %2565 = vmatmul.mubr.msk.bf16.vlgmr.msra.gmra.mrb[0].mxu0 %vm123_vm2, %v110_v7  ;;  %2573 = vmatmul.mubr.msk.bf16.vlgmr.msra.gmra.mrb[0].mxu1 %vm123_vm2, %v110_v7 }
  0x56   :  { %2577 = vmatpush3.bf16.msra.mxu0 %v2876_v8  ;;  %2580 = vmatprep.mubr.msk.bf16.mxu0 %vm3104_vm0, %v3103_v0 }
  0x57   :  { %2578 = vmatprep.subr.bf16.mxu0 %v3103_v0  ;;  %2586 = vmatprep.mubr.msk.bf16.mxu1 %vm3104_vm0, %v3103_v0 }
  0x5a   :  { %2579 = vmatpush3.bf16.msra.mxu0 %v2877_v11 }
  0x5b   :  { %2590 = vmatprep.subr.bf16.mxu0 %v3103_v0  ;;  %2585 = vmatpush3.bf16.xpose.msra.mxu1 %v300_v10 }
  0x5c   :  { %2596 = vmatprep.subr.bf16.mxu1 %v3103_v0 }
  0x5d   :  { %2581 = vmatmul.mubr.msk.bf16.vlgmr.msra.gmra.mrb[4].mxu0 %vm123_vm2, %v110_v7 }
  0x5e   :  { %2592 = vmatprep.mubr.msk.bf16.mxu0 %vm3104_vm0, %v3103_v0 }
  0x63   :  { %2591 = vmatpush3.bf16.xpose.msra.mxu0 %v300_v10 }
  0x64   :  { %2602 = vmatprep.subr.bf16.mxu0 %v3103_v0 }
  0xc2   :  { %v598_v9 = vpop.permute.xlu1 %597 }
  0xc3   :  { %v603_v13 = vsel %vm295_vm1, %v598_v9, 0 }
 0x128   :  { %v161_v18 = vpop.f32.mrb[0].mxu0  ;;  %v214_v21 = vpop.f32.mrb[0].mxu1 }
 0x129   :  { %v291_v19 = vadd.f32 %v3284_v17, %v161_v18  ;;  %v2566_v20 = vpop.f32.mrb[1].mxu0  ;;  %v221_v23 = vpack.c.bf16 %v214_v21, %v214_v21  ;;  %v2574_v24 = vpop.f32.mrb[1].mxu1  ;;  %v283_v39 = vadd.f32 %v3296_v35, %v161_v18 }
 0x12a   :  { %v164_v22 = vpop.f32.mrb[2].mxu0  ;;  %v217_v29 = vpop.f32.mrb[2].mxu1 }
 0x12b   :  { %v293_v26 = vpack.c.bf16 %v291_v19, %v291_v19  ;;  %v292_v27 = vadd.f32 %v3284_v17, %v164_v22  ;;  %v2567_v28 = vpop.f32.mrb[3].mxu0  ;;  %v389_v30 = vsel %vm295_vm1, %v221_v23, 0  ;;  %v222_v31 = vpack.c.bf16 %v217_v29, %v217_v29  ;;  %v2575_v32 = vpop.f32.mrb[3].mxu1 }
 0x12c   :  { %v284_v42 = vadd.f32 %v3296_v35, %v164_v22  ;;  %v285_v44 = vpack.c.bf16 %v283_v39, %v283_v39 }
 0x12d   :  { %v294_v33 = vpack.c.bf16 %v292_v27, %v292_v27  ;;  %592 = vrot.lane.b32.xlu1 %v293_v26, %s3105_s30  ;;  %2587 = vmatmul.mubr.msk.bf16.vlgmr.msra.gmra.mrb[4].mxu1 %vm295_vm1, %v293_v26  ;;  %v435_v34 = vsel %vm295_vm1, %v222_v31, 0 }
 0x12e   :  { %2597 = vmatpush3.bf16.xpose.msra.mxu1 %v389_v30  ;;  %2598 = vmatprep.mubr.msk.bf16.mxu1 %vm3104_vm0, %v3103_v0  ;;  %v286_v46 = vpack.c.bf16 %v284_v42, %v284_v42 }
 0x12f   :  { %2593 = vmatmul.mubr.msk.bf16.vlgmr.msra.gmra.mrb[8].mxu0 %vm295_vm1, %v294_v33  ;;  %2608 = vmatprep.subr.bf16.mxu1 %v3103_v0 }
 0x130   :  { %2603 = vmatpush3.bf16.xpose.msra.mxu0 %v435_v34  ;;  %2604 = vmatprep.mubr.msk.bf16.mxu0 %vm3104_vm0, %v3103_v0  ;;  %v269_v36 = vpop.f32.mrb[4].mxu0 }
 0x131   :  { %695 = vrot.lane.b32.xlu1 %v221_v23, %s3105_s30  ;;  %v2582_v37 = vpop.f32.mrb[5].mxu0  ;;  %2614 = vmatprep.subr.bf16.mxu0 %v3103_v0  ;;  %v3305_v40 = vpack.c.bf16 %v269_v36, %v269_v36 }
 0x132   :  { %v272_v38 = vpop.f32.mrb[6].mxu0 }
 0x133   :  { %v2583_v41 = vpop.f32.mrb[7].mxu0  ;;  %v3309_v43 = vpack.c.bf16 %v272_v38, %v272_v38  ;;  %v503_v45 = vsel %vm501_vm3, %v3305_v40, 0 }
 0x135   :  { %747 = vrot.lane.b32.xlu1 %v222_v31, %s3105_s30  ;;  %v549_v47 = vsel %vm501_vm3, %v3309_v43, 0 }
 0x139   :  { %692 = vrot.lane.b32.xlu1 %v285_v44, %s3105_s30  ;;  %2599 = vmatmul.mubr.msk.bf16.vlgmr.msra.gmra.mrb[4].mxu1 %vm295_vm1, %v285_v44 }
 0x13a   :  { %2609 = vmatpush3.bf16.msra.mxu1 %v503_v45  ;;  %2610 = vmatprep.mubr.msk.bf16.mxu1 %vm3104_vm0, %v3103_v0 }
 0x13b   :  { %2605 = vmatmul.mubr.msk.bf16.vlgmr.msra.gmra.mrb[8].mxu0 %vm295_vm1, %v286_v46  ;;  %2620 = vmatprep.subr.bf16.mxu1 %v3103_v0 }
 0x13c   :  { %2615 = vmatpush3.bf16.msra.mxu0 %v549_v47  ;;  %2616 = vmatprep.mubr.msk.bf16.mxu0 %vm3104_vm0, %v3103_v0 }
 0x13d   :  { %744 = vrot.lane.b32.xlu1 %v286_v46, %s3105_s30  ;;  %2626 = vmatprep.subr.bf16.mxu0 %v3103_v0 }
 0x19f   :  { %v593_v12 = vpop.permute.xlu1 %592 }
 0x1a3   :  { %v696_v21 = vpop.permute.xlu1 %695 }
 0x1a4   :  { %v701_v22 = vsel %vm295_vm1, %v696_v21, 0 }
 0x1a7   :  { %v748_v23 = vpop.permute.xlu1 %747 }
 0x1a8   :  { %v753_v25 = vsel %vm295_vm1, %v748_v23, 0 }
 0x1ab   :  { %v693_v26 = vpop.permute.xlu1 %692 }
 0x1af   :  { %v745_v27 = vpop.permute.xlu1 %744 }
 0x20c   :  { %v425_v50 = vpop.f32.mrb[4].mxu1 }
 0x20d   :  { %v477_v51 = vmul.f32 0.25, %v425_v50  ;;  %v2600_v52 = vpop.f32.mrb[5].mxu1 }
 0x20e   :  { %v428_v53 = vpop.f32.mrb[6].mxu1  ;;  %v471_v54 = vpop.f32.mrb[8].mxu0 }
 0x20f   :  { %v479_v55 = vadd.f32 %v477_v51, %v3327_v49  ;;  %v478_v56 = vmul.f32 0.25, %v471_v54  ;;  %v2601_v57 = vpop.f32.mrb[7].mxu1  ;;  %v2606_v58 = vpop.f32.mrb[9].mxu0 }
 0x210   :  { %v474_v59 = vpop.f32.mrb[10].mxu0 }
 0x211   :  { %v481_v60 = vmul.f32 1.442695, %v479_v55  ;;  %v480_v61 = vadd.f32 %v478_v56, %v3327_v49  ;;  %v2607_v62 = vpop.f32.mrb[11].mxu0 }
 0x213   :  { %2904 = vpow2.f32 %v481_v60  ;;  %v483_v63 = vmul.f32 1.442695, %v480_v61 }
 0x215   :  { %2906 = vpow2.f32 %v483_v63 }
 0x21d   :  { %v2905_v1 = vpop.eup %2904 }
 0x21e   :  { %v486_v2 = vsel %vm485_vm5, %v2905_v1, 0.0 }
 0x21f   :  { %v2907_v3 = vpop.eup %2906  ;;  %487 = vadd.xlane.f32.xlu0 %v486_v2 }
 0x220   :  { %v489_v6 = vsel %vm485_vm5, %v2907_v3, 0.0 }
 0x223   :  { %490 = vadd.xlane.f32.xlu0 %v489_v6 }
 0x239   :  { %646 = vrot.lane.b32.xlu0 %v294_v33, %s3105_s30 }
 0x2ac   :  { %v488_v7 = vpop.xlane.xlu0 %487 }
 0x2ad   :  { %2908 = vrcp.f32 %v488_v7  ;;  %v2879_v7 = vld [vmem:[#allocation7] sm:$0xff]  }
 0x2b0   :  { %v491_v8 = vpop.xlane.xlu0 %490 }
 0x2b1   :  { %2910 = vrcp.f32 %v491_v8  ;;  %v2880_v8 = vld [vmem:[#allocation7 + $0x8] sm:$0xff]  }
 0x2b4   :  { %v647_v24 = vpop.permute.xlu0 %646 }
 0x2b7   :  { %v2909_v10 = vpop.eup %2908 }
 0x2b8   :  { %v494_v11 = vmul.f32 %v2909_v10, %v2905_v1 }
 0x2ba   :  { %v496_v15 = vpack.c.bf16 %v494_v11, %v494_v11 }
 0x2bb   :  { %v2911_v18 = vpop.eup %2910 }
 0x2bc   :  { %v495_v19 = vmul.f32 %v2911_v18, %v2907_v3  ;;  %2611 = vmatmul.mubr.msk.bf16.vlgmr.msra.gmra.mrb[8].mxu1 %vm485_vm5, %v496_v15 }
 0x2bd   :  { %2621 = vmatpush3.bf16.xpose.msra.mxu1 %v603_v13  ;;  %2622 = vmatprep.mubr.msk.bf16.mxu1 %vm3104_vm0, %v3103_v0 }
 0x2be   :  { %v497_v20 = vpack.c.bf16 %v495_v19, %v495_v19  ;;  %2632 = vmatprep.subr.bf16.mxu1 %v3103_v0 }
 0x2c0   :  { %2617 = vmatmul.mubr.msk.bf16.vlgmr.msra.gmra.mrb[12].mxu0 %vm485_vm5, %v497_v20 }
 0x2c1   :  { %2627 = vmatpush3.bf16.xpose.msra.mxu0 %v603_v13  ;;  %2628 = vmatprep.mubr.msk.bf16.mxu0 %vm3104_vm0, %v3103_v0 }
 0x2c2   :  { %2638 = vmatprep.subr.bf16.mxu0 %v3103_v0 }
 0x2c4   :  { %2623 = vmatmul.mubr.msk.bf16.vlgmr.msra.gmra.mrb[12].mxu1 %vm295_vm1, %v593_v12 }
 0x2c5   :  { %2633 = vmatpush3.bf16.xpose.msra.mxu1 %v701_v22  ;;  %2634 = vmatprep.mubr.msk.bf16.mxu1 %vm3104_vm0, %v3103_v0 }
 0x2c6   :  { %2644 = vmatprep.subr.bf16.mxu1 %v3103_v0 }
 0x2c8   :  { %2629 = vmatmul.mubr.msk.bf16.vlgmr.msra.gmra.mrb[16].mxu0 %vm295_vm1, %v647_v24 }
 0x2c9   :  { %2639 = vmatpush3.bf16.xpose.msra.mxu0 %v753_v25  ;;  %2640 = vmatprep.mubr.msk.bf16.mxu0 %vm3104_vm0, %v3103_v0 }
 0x2ca   :  { %2650 = vmatprep.subr.bf16.mxu0 %v3103_v0 }
 0x2d0   :  { %2635 = vmatmul.mubr.msk.bf16.vlgmr.msra.gmra.mrb[12].mxu1 %vm295_vm1, %v693_v26 }
 0x2d1   :  { %2646 = vmatprep.mubr.msk.bf16.mxu1 %vm3104_vm0, %v3103_v0 }
 0x2d4   :  { %2641 = vmatmul.mubr.msk.bf16.vlgmr.msra.gmra.mrb[16].mxu0 %vm295_vm1, %v745_v27 }
 0x2d5   :  { %2652 = vmatprep.mubr.msk.bf16.mxu0 %vm3104_vm0, %v3103_v0 }
 0x38f   :  { %v3359_v28 = vpop.f32.mrb[8].mxu1 }
 0x390   :  { %v2612_v29 = vpop.f32.mrb[9].mxu1 }
 0x391   :  { %v542_v30 = vpop.f32.mrb[10].mxu1 }
 0x392   :  { %v2613_v31 = vpop.f32.mrb[11].mxu1 }
 0x393   :  { %v3361_v32 = vpop.f32.mrb[12].mxu0 }
 0x394   :  { %v2618_v33 = vpop.f32.mrb[13].mxu0 }
 0x395   :  { %v588_v34 = vpop.f32.mrb[14].mxu0 }
 0x396   :  { %v2619_v36 = vpop.f32.mrb[15].mxu0 }
 0x3a3   :  { %v737_v37 = vpop.f32.mrb[12].mxu1 }
 0x3a4   :  { %v795_v38 = vmul.f32 0.25, %v737_v37  ;;  %v2636_v39 = vpop.f32.mrb[13].mxu1 }
 0x3a5   :  { %v740_v41 = vpop.f32.mrb[14].mxu1 }
 0x3a6   :  { %v797_v42 = vadd.f32 %v795_v38, %v3327_v49  ;;  %v2637_v44 = vpop.f32.mrb[15].mxu1 }
 0x3a7   :  { %v789_v45 = vpop.f32.mrb[16].mxu0 }
 0x3a8   :  { %v799_v46 = vmul.f32 1.442695, %v797_v42  ;;  %v796_v47 = vmul.f32 0.25, %v789_v45  ;;  %v2642_v48 = vpop.f32.mrb[17].mxu0 }
 0x3a9   :  { %v792_v50 = vpop.f32.mrb[18].mxu0  ;;  %v2883_v48 = vld [vmem:[%s3663_s5] sm:$0xff]  }
 0x3aa   :  { %2912 = vpow2.f32 %v799_v46  ;;  %v798_v51 = vadd.f32 %v796_v47, %v3327_v49  ;;  %v2643_v52 = vpop.f32.mrb[19].mxu0  ;;  %v2881_v46 = vld [vmem:[#allocation8] sm:$0xff]   ;;  %v2882_v47 = vld [vmem:[#allocation8 + $0x8] sm:$0xff]   ;;  %v1020_v50 = vsub.s32 0, %v3275_v14 }
 0x3ac   :  { %v801_v53 = vmul.f32 1.442695, %v798_v51  ;;  %v2884_v51 = vld [vmem:[%s3663_s5 + $0x8] sm:$0xff]   ;;  %v1021_v52 = vrot.slane %v3281_v16, %v1020_v50 }
 0x3ae   :  { %2914 = vpow2.f32 %v801_v53 }
 0x3b4   :  { %v2913_v54 = vpop.eup %2912 }
 0x3b5   :  { %v803_v55 = vsel %vm485_vm5, %v2913_v54, 0.0 }
 0x3b6   :  { %804 = vadd.xlane.f32.xlu1 %v803_v55 }
 0x3b8   :  { %v2915_v56 = vpop.eup %2914 }
 0x3b9   :  { %v806_v57 = vsel %vm485_vm5, %v2915_v56, 0.0 }
 0x3ba   :  { %807 = vadd.xlane.f32.xlu0 %v806_v57 }
 0x3c7   :  { %816 = vrot.lane.b32.xlu1 %v3305_v40, %s3105_s30 }
 0x3d0   :  { %865 = vrot.lane.b32.xlu0 %v3309_v43, %s3105_s30 }
 0x443   :  { %v805_v58 = vpop.xlane.xlu1 %804 }
 0x444   :  { %2916 = vrcp.f32 %v805_v58 }
 0x447   :  { %v817_v59 = vpop.permute.xlu1 %816  ;;  %v808_v60 = vpop.xlane.xlu0 %807 }
 0x448   :  { %v822_v61 = vsel %vm501_vm3, %v817_v59, 0  ;;  %2918 = vrcp.f32 %v808_v60 }
 0x449   :  { %2645 = vmatpush3.bf16.msra.mxu1 %v822_v61 }
 0x44a   :  { %2656 = vmatprep.subr.bf16.mxu1 %v3103_v0 }
 0x44b   :  { %v866_v62 = vpop.permute.xlu0 %865 }
 0x44c   :  { %v871_v63 = vsel %vm501_vm3, %v866_v62, 0 }
 0x44d   :  { %2651 = vmatpush3.bf16.msra.mxu0 %v871_v63  ;;  %v2885_v63 = vld [vmem:[%s3663_s5 + $0x10] sm:$0xff]  }
 0x44e   :  { %v2917_v1 = vpop.eup %2916  ;;  %2664 = vmatprep.subr.bf16.mxu0 %v3103_v0 }
 0x44f   :  { %v811_v40 = vmul.f32 %v2917_v1, %v2913_v54  ;;  %v2886_v1 = vld [vmem:[%s3663_s5 + $0x18] sm:$0xff]  }
 0x451   :  { %v813_v2 = vpack.c.bf16 %v811_v40, %v811_v40 }
 0x452   :  { %v2919_v43 = vpop.eup %2918 }
 0x453   :  { %v812_v3 = vmul.f32 %v2919_v43, %v2915_v56  ;;  %2647 = vmatmul.mubr.msk.bf16.vlgmr.msra.gmra.mrb[16].mxu1 %vm485_vm5, %v813_v2 }
 0x454   :  { %2660 = vmatprep.mubr.msk.bf16.mxu1 %vm3104_vm0, %v3103_v0  ;;  %2657 = vmatpush3.bf16.msra.mxu1 %v2879_v7 }
 0x455   :  { %v814_v6 = vpack.c.bf16 %v812_v3, %v812_v3  ;;  %2658 = vmatprep.subr.bf16.mxu1 %v3103_v0 }
 0x457   :  { %2653 = vmatmul.mubr.msk.bf16.vlgmr.msra.gmra.mrb[20].mxu0 %vm485_vm5, %v814_v6 }
 0x458   :  { %2668 = vmatprep.mubr.msk.bf16.mxu0 %vm3104_vm0, %v3103_v0  ;;  %2659 = vmatpush3.bf16.msra.mxu1 %v2880_v8 }
 0x459   :  { %2672 = vmatprep.subr.bf16.mxu1 %v3103_v0  ;;  %2665 = vmatpush3.bf16.msra.mxu0 %v2881_v46 }
 0x45a   :  { %2666 = vmatprep.subr.bf16.mxu0 %v3103_v0 }
 0x45d   :  { %2667 = vmatpush3.bf16.msra.mxu0 %v2882_v47 }
 0x45e   :  { %2684 = vmatprep.subr.bf16.mxu0 %v3103_v0 }
 0x526   :  { %v858_v9 = vpop.f32.mrb[16].mxu1 }
 0x527   :  { %v2648_v10 = vpop.f32.mrb[17].mxu1 }
 0x528   :  { %v861_v11 = vpop.f32.mrb[18].mxu1 }
 0x529   :  { %v2649_v12 = vpop.f32.mrb[19].mxu1 }
 0x52a   :  { %v907_v13 = vpop.f32.mrb[20].mxu0 }
 0x52b   :  { %v2862_v15 = vpack.i.bf16 %v907_v13, %v858_v9  ;;  %v2654_v18 = vpop.f32.mrb[21].mxu0 }
 0x52c   :  { %v910_v19 = vpop.f32.mrb[22].mxu0 }
 0x52d   :  { %2863 = vrot.lane.b32.xlu1 %v2862_v15, %s3106_s13  ;;  %v2655_v20 = vpop.f32.mrb[23].mxu0 }
 0x59f   :  { %v2864_v21 = vpop.permute.xlu1 %2863 }
 0x5a0   :  { %v2866_v22 = vunpack.i.h.bf16 %v2864_v21  ;;  %v2865_v23 = vunpack.i.l.bf16 %v2864_v21 }
 0x5a2   :  { %v922_v24 = vsel %vm295_vm1, %v3361_v32, %v2866_v22  ;;  %v921_v25 = vsel %vm295_vm1, %v3359_v28, %v2865_v23 }
 0x5a3   :  { %v927_v26 = vpack.c.bf16 %v922_v24, %v921_v25 }
 0x5a5   :  { %2661 = vmatmul.mubr.msk.bf16.vlgmr.msra.gmra.mrb[20].mxu1 %vm123_vm2, %v927_v26 }
 0x5a6   :  { %2680 = vmatprep.mubr.msk.bf16.mxu1 %vm3104_vm0, %v3103_v0  ;;  %2673 = vmatpush3.bf16.msra.mxu1 %v2883_v48 }
 0x5a7   :  { %2674 = vmatprep.subr.bf16.mxu1 %v3103_v0 }
 0x5aa   :  { %2675 = vmatpush3.bf16.msra.mxu1 %v2884_v51  ;;  %v2891_v51 = vld [vmem:[%s3660_s2 + $0x40] sm:$0xff]  }
 0x5ab   :  { %2676 = vmatprep.subr.bf16.mxu1 %v3103_v0 }
 0x5ae   :  { %2677 = vmatpush3.bf16.msra.mxu1 %v2885_v63 }
 0x5af   :  { %2678 = vmatprep.subr.bf16.mxu1 %v3103_v0 }
 0x5b2   :  { %2679 = vmatpush3.bf16.msra.mxu1 %v2886_v1 }
 0x5b3   :  { %2700 = vmatprep.subr.bf16.mxu1 %v3103_v0 }
 0x678   :  { %v977_v27 = vpop.f32.mrb[20].mxu1 }
 0x679   :  { %v984_v29 = vadd.f32 %v977_v27, %v3242_v4  ;;  %v2662_v30 = vpop.f32.mrb[21].mxu1 }
 0x67a   :  { %v980_v31 = vpop.f32.mrb[22].mxu1 }
 0x67b   :  { %v985_v33 = vadd.f32 %v980_v31, %v3244_v5  ;;  %v2663_v34 = vpop.f32.mrb[23].mxu1  ;;  %v986_v36 = vsel %vm123_vm2, %v984_v29, 0.0 }
 0x67c   :  { %987 = vadd.xlane.f32.xlu1 %v986_v36 }
 0x67d   :  { %v989_v32 = vsel %vm123_vm2, %v985_v33, 0.0 }
 0x67e   :  { %990 = vadd.xlane.f32.xlu0 %v989_v32 }
 0x709   :  { %v988_v28 = vpop.xlane.xlu1 %987 }
 0x70a   :  { %v993_v37 = vmul.f32 0.03125, %v988_v28  ;;  %v2887_v28 = vld [vmem:[%s3660_s2 + $0x30] sm:$0xff]  }
 0x70b   :  { %v991_v38 = vpop.xlane.xlu0 %990 }
 0x70c   :  { %v995_v39 = vsub.f32 %v984_v29, %v993_v37  ;;  %v994_v41 = vmul.f32 0.03125, %v991_v38  ;;  %v2888_v37 = vld [vmem:[%s3660_s2 + $0x50] sm:$0xff]   ;;  %v2889_v38 = vld [vmem:[%s3660_s2 + $0x38] sm:$0xff]  }
 0x70e   :  { %v996_v42 = vsub.f32 %v985_v33, %v994_v41  ;;  %v997_v44 = vmul.f32 %v995_v39, %v995_v39 }
 0x710   :  { %v999_v4 = vsel %vm123_vm2, %v997_v44, 0.0  ;;  %v998_v45 = vmul.f32 %v996_v42, %v996_v42 }
 0x711   :  { %1000 = vadd.xlane.f32.xlu0 %v999_v4 }
 0x712   :  { %v1002_v5 = vsel %vm123_vm2, %v998_v45, 0.0 }
 0x713   :  { %1003 = vadd.xlane.f32.xlu1 %v1002_v5 }
 0x727   :  { %1114 = vrot.lane.b32.xlu0 %v1021_v52, %s3096_s19 }
 0x79e   :  { %v1001_v53 = vpop.xlane.xlu0 %1000 }
 0x79f   :  { %v1005_v54 = vmul.f32 0.03125, %v1001_v53  ;;  %v3457_v53 = vld [vmem:[#allocation5 + $0x4] sm:$0xf] }
 0x7a0   :  { %v1004_v55 = vpop.xlane.xlu1 %1003 }
 0x7a1   :  { %v1007_v56 = vadd.f32 1e-05, %v1005_v54  ;;  %v1006_v57 = vmul.f32 0.03125, %v1004_v55  ;;  %v2892_v54 = vld [vmem:[%s3660_s2 + $0x48] sm:$0xff]   ;;  %v1386_v55 = vsel %vm295_vm1, %v3457_v53, 0 }
 0x7a2   :  { %v1115_v11 = vpop.permute.xlu0 %1114 }
 0x7a3   :  { %2920 = vrsqrt.f32 %v1007_v56  ;;  %v1008_v58 = vadd.f32 1e-05, %v1006_v57 }
 0x7a5   :  { %2922 = vrsqrt.f32 %v1008_v58 }
 0x7ad   :  { %v2921_v59 = vpop.eup %2920 }
 0x7ae   :  { %v1011_v61 = vmul.f32 %v2921_v59, %v995_v39  ;;  %v2890_v39 = vld [vmem:[%s3660_s2 + $0x58] sm:$0xff]  }
 0x7af   :  { %v2923_v60 = vpop.eup %2922 }
 0x7b0   :  { %v1012_v62 = vmul.f32 %v2923_v60, %v996_v42 }
 0x7b2   :  { %v1017_v16 = vpack.c.bf16 %v1012_v62, %v1011_v61 }
 0x7b4   :  { %2669 = vmatmul.mubr.msk.bf16.vlgmr.msra.gmra.mrb[24].mxu0 %vm123_vm2, %v1017_v16 }
 0x7b5   :  { %2688 = vmatprep.mubr.msk.bf16.mxu0 %vm3104_vm0, %v3103_v0  ;;  %2685 = vmatpush3.bf16.msra.mxu0 %v2887_v28 }
 0x7b6   :  { %2686 = vmatprep.subr.bf16.mxu0 %v3103_v0 }
 0x7b9   :  { %2687 = vmatpush3.bf16.msra.mxu0 %v2889_v38 }
 0x7ba   :  { %2692 = vmatprep.subr.bf16.mxu0 %v3103_v0 }
 0x887   :  { %v1071_v40 = vpop.f32.mrb[24].mxu0 }
 0x888   :  { %v1072_v2 = vadd.f32 %v1071_v40, %v1021_v52  ;;  %v2670_v43 = vpop.f32.mrb[25].mxu0 }
 0x889   :  { %v1074_v3 = vpop.f32.mrb[26].mxu0 }
 0x88a   :  { %v1075_v6 = vadd.f32 %v1074_v3, %v1021_v52  ;;  %v2671_v7 = vpop.f32.mrb[27].mxu0  ;;  %v1078_v8 = vmax.f32 %v1072_v2, 0.0 }
 0x88c   :  { %v1079_v9 = vmax.f32 %v1075_v6, 0.0 }
 0x88e   :  { %v1088_v10 = vpack.c.bf16 %v1079_v9, %v1078_v8 }
 0x890   :  { %2681 = vmatmul.mubr.msk.bf16.vlgmr.msra.gmra.mrb[24].mxu1 %vm1117_vm6, %v1088_v10 }
 0x891   :  { %2704 = vmatprep.mubr.msk.bf16.mxu1 %vm3104_vm0, %v3103_v0  ;;  %2701 = vmatpush3.bf16.msra.mxu1 %v2888_v37 }
 0x892   :  { %2702 = vmatprep.subr.bf16.mxu1 %v3103_v0 }
 0x895   :  { %2703 = vmatpush3.bf16.msra.mxu1 %v2890_v39 }
 0x896   :  { %2714 = vmatprep.subr.bf16.mxu1 %v3103_v0 }
 0x963   :  { %v1155_v12 = vpop.f32.mrb[24].mxu1 }
 0x964   :  { %v1156_v13 = vadd.f32 %v1155_v12, %v1115_v11  ;;  %v2682_v15 = vpop.f32.mrb[25].mxu1 }
 0x965   :  { %v1158_v18 = vpop.f32.mrb[26].mxu1 }
 0x966   :  { %v1159_v19 = vadd.f32 %v1158_v18, %v1115_v11  ;;  %v2683_v20 = vpop.f32.mrb[27].mxu1  ;;  %v1162_v21 = vadd.f32 %v1156_v13, %v1011_v61 }
 0x968   :  { %v1164_v22 = vsel %vm123_vm2, %v1162_v21, 0.0  ;;  %v1163_v23 = vadd.f32 %v1159_v19, %v1012_v62 }
 0x969   :  { %1165 = vadd.xlane.f32.xlu1 %v1164_v22 }
 0x96a   :  { %v1167_v24 = vsel %vm123_vm2, %v1163_v23, 0.0 }
 0x96d   :  { %1168 = vadd.xlane.f32.xlu1 %v1167_v24 }
 0x9f6   :  { %v1166_v25 = vpop.xlane.xlu1 %1165 }
 0x9f7   :  { %v1170_v26 = vmul.f32 0.03125, %v1166_v25 }
 0x9f9   :  { %v1172_v27 = vsub.f32 %v1162_v21, %v1170_v26 }
 0x9fa   :  { %v1169_v29 = vpop.xlane.xlu1 %1168 }
 0x9fb   :  { %v1171_v30 = vmul.f32 0.03125, %v1169_v29  ;;  %v1174_v31 = vmul.f32 %v1172_v27, %v1172_v27 }
 0x9fd   :  { %v1173_v33 = vsub.f32 %v1163_v23, %v1171_v30  ;;  %v1176_v34 = vsel %vm123_vm2, %v1174_v31, 0.0 }
 0x9fe   :  { %1177 = vadd.xlane.f32.xlu1 %v1176_v34 }
 0x9ff   :  { %v1175_v36 = vmul.f32 %v1173_v33, %v1173_v33 }
 0xa01   :  { %v1179_v32 = vsel %vm123_vm2, %v1175_v36, 0.0 }
 0xa02   :  { %1180 = vadd.xlane.f32.xlu1 %v1179_v32 }
 0xa8b   :  { %v1178_v41 = vpop.xlane.xlu1 %1177 }
 0xa8c   :  { %v1182_v42 = vmul.f32 0.03125, %v1178_v41  ;;  %v2440_v41 = vcombine.low %v3457_v53, %v3457_v53 }
 0xa8e   :  { %v1184_v44 = vadd.f32 1e-05, %v1182_v42 }
 0xa8f   :  { %v1181_v4 = vpop.xlane.xlu1 %1180 }
 0xa90   :  { %2924 = vrsqrt.f32 %v1184_v44  ;;  %v1183_v45 = vmul.f32 0.03125, %v1181_v4 }
 0xa92   :  { %v1185_v5 = vadd.f32 1e-05, %v1183_v45 }
 0xa94   :  { %2926 = vrsqrt.f32 %v1185_v5 }
 0xa9a   :  { %v2925_v46 = vpop.eup %2924 }
 0xa9b   :  { %v3444_v47 = vmul.f32 %v2925_v46, %v1172_v27 }
 0xa9d   :  { %1190 = vst.msk [vmem:[#allocation10] sm:$0xff] %vm123_vm2, %v3444_v47 }
 0xa9e   :  { %v2927_v48 = vpop.eup %2926 }
 0xa9f   :  { %v3448_v50 = vmul.f32 %v2927_v48, %v1173_v33 }
 0xaa1   :  { %1191 = vst.msk [vmem:[#allocation10 + $0x8] sm:$0xff] %vm123_vm2, %v3448_v50  ;;  %v1205_v52 = vpack.c.bf16 %v3448_v50, %v3444_v47 }
 0xaa3   :  { %2689 = vmatmul.mubr.msk.bf16.vlgmr.msra.gmra.mrb[28].mxu0 %vm123_vm2, %v1205_v52  ;;  %2705 = vmatmul.mubr.msk.bf16.vlgmr.msra.gmra.mrb[28].mxu1 %vm123_vm2, %v1205_v52 }
 0xaa4   :  { %2693 = vmatpush3.bf16.msra.mxu0 %v2891_v51  ;;  %2696 = vmatprep.mubr.msk.bf16.mxu0 %vm3104_vm0, %v3103_v0 }
 0xaa5   :  { %2694 = vmatprep.subr.bf16.mxu0 %v3103_v0  ;;  %2715 = vmatpush3.bf16.xpose.msra.mxu1 %v1386_v55 }
 0xaa6   :  { %2716 = vmatprep.mubr.msk.bf16.mxu1 %vm3104_vm0, %v3103_v0  ;;  %2726 = vmatprep.subr.bf16.mxu1 %v3103_v0 }
 0xaa8   :  { %2695 = vmatpush3.bf16.msra.mxu0 %v2892_v54 }
 0xaa9   :  { %2708 = vmatprep.subr.bf16.mxu0 %v3103_v0 }
 0xaab   :  { %2697 = vmatmul.mubr.msk.bf16.vlgmr.msra.gmra.mrb[32].mxu0 %vm123_vm2, %v1205_v52 }
 0xaac   :  { %2710 = vmatprep.mubr.msk.bf16.mxu0 %vm3104_vm0, %v3103_v0 }
 0xab1   :  { %2709 = vmatpush3.bf16.xpose.msra.mxu0 %v1386_v55 }
 0xab2   :  { %2720 = vmatprep.subr.bf16.mxu0 %v3103_v0 }
 0xb76   :  { %v1255_v56 = vpop.f32.mrb[28].mxu0  ;;  %v1363_v57 = vpop.f32.mrb[28].mxu1 }
 0xb77   :  { %v1378_v58 = vadd.f32 %v1255_v56, %v3284_v17  ;;  %v2690_v59 = vpop.f32.mrb[29].mxu0  ;;  %v2706_v60 = vpop.f32.mrb[29].mxu1  ;;  %v3489_v12 = vpack.c.bf16 %v1363_v57, %v1363_v57 }
 0xb78   :  { %v1258_v61 = vpop.f32.mrb[30].mxu0  ;;  %v1366_v62 = vpop.f32.mrb[30].mxu1 }
 0xb79   :  { %v1380_v16 = vpack.c.bf16 %v1378_v58, %v1378_v58  ;;  %v2691_v63 = vpop.f32.mrb[31].mxu0  ;;  %v2707_v1 = vpop.f32.mrb[31].mxu1  ;;  %v1379_v40 = vadd.f32 %v1258_v61, %v3284_v17  ;;  %v1374_v17 = vadd.f32 %v1255_v56, %v3296_v35  ;;  %v1375_v13 = vadd.f32 %v1258_v61, %v3296_v35 }
 0xb7a   :  { %v3493_v18 = vpack.c.bf16 %v1366_v62, %v1366_v62  ;;  %v1587_v19 = vsel %vm501_vm3, %v3489_v12, 0 }
 0xb7b   :  { %2711 = vmatmul.mubr.msk.bf16.vlgmr.msra.gmra.mrb[36].mxu0 %vm295_vm1, %v1380_v16  ;;  %v1381_v2 = vpack.c.bf16 %v1379_v40, %v1379_v40  ;;  %v1376_v15 = vpack.c.bf16 %v1374_v17, %v1374_v17  ;;  %v1377_v20 = vpack.c.bf16 %v1375_v13, %v1375_v13 }
 0xb7c   :  { %2722 = vmatprep.mubr.msk.bf16.mxu0 %vm3104_vm0, %v3103_v0  ;;  %v1633_v21 = vsel %vm501_vm3, %v3493_v18, 0 }
 0xb7d   :  { %2717 = vmatmul.mubr.msk.bf16.vlgmr.msra.gmra.mrb[32].mxu1 %vm295_vm1, %v1381_v2 }
 0xb7e   :  { %v1308_v43 = vpop.f32.mrb[32].mxu0  ;;  %2728 = vmatprep.mubr.msk.bf16.mxu1 %vm3104_vm0, %v3103_v0 }
 0xb7f   :  { %v1315_v3 = vpack.c.bf16 %v1308_v43, %v1308_v43  ;;  %v2698_v6 = vpop.f32.mrb[33].mxu0 }
 0xb80   :  { %v1311_v7 = vpop.f32.mrb[34].mxu0 }
 0xb81   :  { %v1475_v8 = vsel %vm295_vm1, %v1315_v3, 0  ;;  %v1316_v9 = vpack.c.bf16 %v1311_v7, %v1311_v7  ;;  %v2699_v10 = vpop.f32.mrb[35].mxu0 }
 0xb82   :  { %2721 = vmatpush3.bf16.xpose.msra.mxu0 %v1475_v8 }
 0xb83   :  { %v1521_v11 = vsel %vm295_vm1, %v1316_v9, 0  ;;  %2732 = vmatprep.subr.bf16.mxu0 %v3103_v0 }
 0xb84   :  { %2727 = vmatpush3.bf16.xpose.msra.mxu1 %v1521_v11 }
 0xb85   :  { %2738 = vmatprep.subr.bf16.mxu1 %v3103_v0 }
 0xb89   :  { %2723 = vmatmul.mubr.msk.bf16.vlgmr.msra.gmra.mrb[36].mxu0 %vm295_vm1, %v1376_v15 }
 0xb8a   :  { %2733 = vmatpush3.bf16.msra.mxu0 %v1587_v19  ;;  %2734 = vmatprep.mubr.msk.bf16.mxu0 %vm3104_vm0, %v3103_v0 }
 0xb8b   :  { %2729 = vmatmul.mubr.msk.bf16.vlgmr.msra.gmra.mrb[32].mxu1 %vm295_vm1, %v1377_v20  ;;  %2744 = vmatprep.subr.bf16.mxu0 %v3103_v0 }
 0xb8c   :  { %2739 = vmatpush3.bf16.msra.mxu1 %v1633_v21  ;;  %2740 = vmatprep.mubr.msk.bf16.mxu1 %vm3104_vm0, %v3103_v0 }
 0xb8d   :  { %2750 = vmatprep.subr.bf16.mxu1 %v3103_v0 }
 0xc5c   :  { %v1511_v35 = vpop.f32.mrb[36].mxu0 }
 0xc5d   :  { %v1563_v22 = vmul.f32 0.25, %v1511_v35  ;;  %v2724_v23 = vpop.f32.mrb[37].mxu0 }
 0xc5e   :  { %v1514_v24 = vpop.f32.mrb[38].mxu0  ;;  %v1557_v25 = vpop.f32.mrb[32].mxu1 }
 0xc5f   :  { %v1565_v26 = vadd.f32 %v1563_v22, %v3327_v49  ;;  %v1564_v27 = vmul.f32 0.25, %v1557_v25  ;;  %v2725_v29 = vpop.f32.mrb[39].mxu0  ;;  %v2730_v30 = vpop.f32.mrb[33].mxu1 }
 0xc60   :  { %v1560_v31 = vpop.f32.mrb[34].mxu1 }
 0xc61   :  { %v1567_v33 = vmul.f32 1.442695, %v1565_v26  ;;  %v1566_v34 = vadd.f32 %v1564_v27, %v3327_v49  ;;  %v2731_v36 = vpop.f32.mrb[35].mxu1 }
 0xc63   :  { %2928 = vpow2.f32 %v1567_v33  ;;  %v1569_v32 = vmul.f32 1.442695, %v1566_v34 }
 0xc65   :  { %2930 = vpow2.f32 %v1569_v32 }
 0xc6d   :  { %v2929_v28 = vpop.eup %2928 }
 0xc6e   :  { %v1571_v37 = vsel %vm485_vm5, %v2929_v28, 0.0 }
 0xc6f   :  { %v2931_v38 = vpop.eup %2930  ;;  %1572 = vadd.xlane.f32.xlu1 %v1571_v37  ;;  %v2894_v37 = vld [vmem:[#allocation7 + $0x10] sm:$0xff]  }
 0xc70   :  { %v1574_v39 = vsel %vm485_vm5, %v2931_v38, 0.0 }
 0xc71   :  { %1575 = vadd.xlane.f32.xlu0 %v1574_v39 }
 0xc80   :  { %1681 = vrot.lane.b32.xlu1 %v2440_v41, %s3105_s30 }
 0xc84   :  { %1676 = vrot.lane.b32.xlu1 %v1380_v16, %s3105_s30 }
 0xc87   :  { %1776 = vrot.lane.b32.xlu0 %v1376_v15, %s3105_s30 }
 0xc88   :  { %1730 = vrot.lane.b32.xlu1 %v1381_v2, %s3105_s30 }
 0xc8c   :  { %1779 = vrot.lane.b32.xlu1 %v1315_v3, %s3105_s30 }
 0xc90   :  { %1831 = vrot.lane.b32.xlu1 %v1316_v9, %s3105_s30 }
 0xc94   :  { %1828 = vrot.lane.b32.xlu1 %v1377_v20, %s3105_s30 }
 0xcfc   :  { %v1573_v42 = vpop.xlane.xlu1 %1572 }
 0xcfd   :  { %2932 = vrcp.f32 %v1573_v42 }
 0xcfe   :  { %v1576_v44 = vpop.xlane.xlu0 %1575 }
 0xcff   :  { %2934 = vrcp.f32 %v1576_v44 }
 0xd00   :  { %v1682_v4 = vpop.permute.xlu1 %1681 }
 0xd01   :  { %v1687_v53 = vsel %vm295_vm1, %v1682_v4, 0 }
 0xd02   :  { %v1777_v60 = vpop.permute.xlu0 %1776 }
 0xd04   :  { %v1677_v45 = vpop.permute.xlu1 %1676 }
 0xd07   :  { %v2933_v5 = vpop.eup %2932 }
 0xd08   :  { %v1579_v46 = vmul.f32 %v2933_v5, %v2929_v28  ;;  %v1731_v48 = vpop.permute.xlu1 %1730 }
 0xd09   :  { %v2935_v51 = vpop.eup %2934 }
 0xd0a   :  { %v1580_v52 = vmul.f32 %v2935_v51, %v2931_v38  ;;  %v1581_v54 = vpack.c.bf16 %v1579_v46, %v1579_v46  ;;  %v2895_v38 = vld [vmem:[#allocation7 + $0x18] sm:$0xff]  }
 0xd0c   :  { %2735 = vmatmul.mubr.msk.bf16.vlgmr.msra.gmra.mrb[40].mxu0 %vm485_vm5, %v1581_v54  ;;  %v1582_v55 = vpack.c.bf16 %v1580_v52, %v1580_v52  ;;  %v1780_v56 = vpop.permute.xlu1 %1779 }
 0xd0d   :  { %2745 = vmatpush3.bf16.xpose.msra.mxu0 %v1687_v53  ;;  %2746 = vmatprep.mubr.msk.bf16.mxu0 %vm3104_vm0, %v3103_v0  ;;  %v1785_v58 = vsel %vm295_vm1, %v1780_v56, 0 }
 0xd0e   :  { %2741 = vmatmul.mubr.msk.bf16.vlgmr.msra.gmra.mrb[36].mxu1 %vm485_vm5, %v1582_v55  ;;  %2756 = vmatprep.subr.bf16.mxu0 %v3103_v0 }
 0xd0f   :  { %2751 = vmatpush3.bf16.xpose.msra.mxu1 %v1687_v53  ;;  %2752 = vmatprep.mubr.msk.bf16.mxu1 %vm3104_vm0, %v3103_v0 }
 0xd10   :  { %2762 = vmatprep.subr.bf16.mxu1 %v3103_v0  ;;  %v1832_v57 = vpop.permute.xlu1 %1831 }
 0xd11   :  { %v1837_v59 = vsel %vm295_vm1, %v1832_v57, 0 }
 0xd14   :  { %2747 = vmatmul.mubr.msk.bf16.vlgmr.msra.gmra.mrb[44].mxu0 %vm295_vm1, %v1677_v45  ;;  %v1829_v61 = vpop.permute.xlu1 %1828 }
 0xd15   :  { %2757 = vmatpush3.bf16.xpose.msra.mxu0 %v1785_v58  ;;  %2758 = vmatprep.mubr.msk.bf16.mxu0 %vm3104_vm0, %v3103_v0 }
 0xd16   :  { %2753 = vmatmul.mubr.msk.bf16.vlgmr.msra.gmra.mrb[40].mxu1 %vm295_vm1, %v1731_v48  ;;  %2768 = vmatprep.subr.bf16.mxu0 %v3103_v0 }
 0xd17   :  { %2763 = vmatpush3.bf16.xpose.msra.mxu1 %v1837_v59  ;;  %2764 = vmatprep.mubr.msk.bf16.mxu1 %vm3104_vm0, %v3103_v0 }
 0xd18   :  { %2774 = vmatprep.subr.bf16.mxu1 %v3103_v0 }
 0xd20   :  { %2759 = vmatmul.mubr.msk.bf16.vlgmr.msra.gmra.mrb[44].mxu0 %vm295_vm1, %v1777_v60 }
 0xd21   :  { %2770 = vmatprep.mubr.msk.bf16.mxu0 %vm3104_vm0, %v3103_v0 }
 0xd22   :  { %2765 = vmatmul.mubr.msk.bf16.vlgmr.msra.gmra.mrb[40].mxu1 %vm295_vm1, %v1829_v61 }
 0xd23   :  { %2776 = vmatprep.mubr.msk.bf16.mxu1 %vm3104_vm0, %v3103_v0 }
 0xddf   :  { %v3545_v62 = vpop.f32.mrb[40].mxu0 }
 0xde0   :  { %v2736_v16 = vpop.f32.mrb[41].mxu0 }
 0xde1   :  { %v1626_v63 = vpop.f32.mrb[42].mxu0  ;;  %v3547_v1 = vpop.f32.mrb[36].mxu1 }
 0xde2   :  { %v2737_v40 = vpop.f32.mrb[43].mxu0  ;;  %v2742_v2 = vpop.f32.mrb[37].mxu1 }
 0xde3   :  { %v1672_v43 = vpop.f32.mrb[38].mxu1 }
 0xde4   :  { %v2743_v3 = vpop.f32.mrb[39].mxu1 }
 0xdf3   :  { %v1821_v6 = vpop.f32.mrb[44].mxu0 }
 0xdf4   :  { %v1879_v7 = vmul.f32 0.25, %v1821_v6  ;;  %v2760_v8 = vpop.f32.mrb[45].mxu0 }
 0xdf5   :  { %v1824_v9 = vpop.f32.mrb[46].mxu0  ;;  %v1873_v10 = vpop.f32.mrb[40].mxu1 }
 0xdf6   :  { %v1881_v17 = vadd.f32 %v1879_v7, %v3327_v49  ;;  %v1880_v11 = vmul.f32 0.25, %v1873_v10  ;;  %v2761_v13 = vpop.f32.mrb[47].mxu0  ;;  %v2766_v15 = vpop.f32.mrb[41].mxu1  ;;  %v2896_v9 = vld [vmem:[#allocation8 + $0x10] sm:$0xff]   ;;  %v2897_v10 = vld [vmem:[#allocation8 + $0x18] sm:$0xff]  }
 0xdf7   :  { %v1876_v19 = vpop.f32.mrb[42].mxu1  ;;  %v2899_v13 = vld [vmem:[%s3663_s5 + $0x28] sm:$0xff]   ;;  %v3595_v15 = vld [vmem:[%s3665_s7] sm:$0xff] }
 0xdf8   :  { %v1883_v20 = vmul.f32 1.442695, %v1881_v17  ;;  %v1882_v21 = vadd.f32 %v1880_v11, %v3327_v49  ;;  %v2767_v35 = vpop.f32.mrb[43].mxu1  ;;  %v2898_v17 = vld [vmem:[%s3663_s5 + $0x20] sm:$0xff]   ;;  %v2105_v11 = vsub.s32 1, %v3275_v14 }
 0xdfa   :  { %2936 = vpow2.f32 %v1883_v20  ;;  %v1885_v22 = vmul.f32 1.442695, %v1882_v21  ;;  %v2106_v19 = vrot.slane %v3595_v15, %v2105_v11 }
 0xdfc   :  { %2938 = vpow2.f32 %v1885_v22 }
 0xe04   :  { %v2937_v23 = vpop.eup %2936 }
 0xe05   :  { %v1887_v24 = vsel %vm485_vm5, %v2937_v23, 0.0 }
 0xe06   :  { %v2939_v25 = vpop.eup %2938  ;;  %1888 = vadd.xlane.f32.xlu1 %v1887_v24 }
 0xe07   :  { %v1890_v26 = vsel %vm485_vm5, %v2939_v25, 0.0 }
 0xe08   :  { %1891 = vadd.xlane.f32.xlu0 %v1890_v26 }
 0xe17   :  { %1900 = vrot.lane.b32.xlu1 %v3489_v12, %s3105_s30 }
 0xe1e   :  { %1949 = vrot.lane.b32.xlu0 %v3493_v18, %s3105_s30 }
 0xe93   :  { %v1889_v27 = vpop.xlane.xlu1 %1888 }
 0xe94   :  { %2940 = vrcp.f32 %v1889_v27 }
 0xe95   :  { %v1892_v49 = vpop.xlane.xlu0 %1891 }
 0xe96   :  { %2942 = vrcp.f32 %v1892_v49 }
 0xe97   :  { %v1901_v29 = vpop.permute.xlu1 %1900 }
 0xe98   :  { %v1906_v30 = vsel %vm501_vm3, %v1901_v29, 0 }
 0xe99   :  { %v1950_v31 = vpop.permute.xlu0 %1949  ;;  %2769 = vmatpush3.bf16.msra.mxu0 %v1906_v30  ;;  %v2900_v30 = vld [vmem:[%s3663_s5 + $0x30] sm:$0xff]  }
 0xe9a   :  { %v1955_v33 = vsel %vm501_vm3, %v1950_v31, 0  ;;  %2780 = vmatprep.subr.bf16.mxu0 %v3103_v0  ;;  %v2901_v31 = vld [vmem:[%s3663_s5 + $0x38] sm:$0xff]  }
 0xe9b   :  { %2775 = vmatpush3.bf16.msra.mxu1 %v1955_v33 }
 0xe9c   :  { %2788 = vmatprep.subr.bf16.mxu1 %v3103_v0 }
 0xe9e   :  { %v2941_v12 = vpop.eup %2940 }
 0xe9f   :  { %v1895_v34 = vmul.f32 %v2941_v12, %v2937_v23 }
 0xea0   :  { %v2943_v36 = vpop.eup %2942 }
 0xea1   :  { %v1896_v18 = vmul.f32 %v2943_v36, %v2939_v25  ;;  %v1897_v32 = vpack.c.bf16 %v1895_v34, %v1895_v34 }
 0xea3   :  { %2771 = vmatmul.mubr.msk.bf16.vlgmr.msra.gmra.mrb[48].mxu0 %vm485_vm5, %v1897_v32  ;;  %v1898_v28 = vpack.c.bf16 %v1896_v18, %v1896_v18 }
 0xea4   :  { %2784 = vmatprep.mubr.msk.bf16.mxu0 %vm3104_vm0, %v3103_v0  ;;  %2781 = vmatpush3.bf16.msra.mxu0 %v2894_v37 }
 0xea5   :  { %2777 = vmatmul.mubr.msk.bf16.vlgmr.msra.gmra.mrb[44].mxu1 %vm485_vm5, %v1898_v28  ;;  %2782 = vmatprep.subr.bf16.mxu0 %v3103_v0 }
 0xea6   :  { %2792 = vmatprep.mubr.msk.bf16.mxu1 %vm3104_vm0, %v3103_v0  ;;  %2789 = vmatpush3.bf16.msra.mxu1 %v2896_v9 }
 0xea7   :  { %2790 = vmatprep.subr.bf16.mxu1 %v3103_v0 }
 0xea8   :  { %2783 = vmatpush3.bf16.msra.mxu0 %v2895_v38 }
 0xea9   :  { %2796 = vmatprep.subr.bf16.mxu0 %v3103_v0 }
 0xeaa   :  { %2791 = vmatpush3.bf16.msra.mxu1 %v2897_v10 }
 0xeab   :  { %2808 = vmatprep.subr.bf16.mxu1 %v3103_v0 }
 0xf76   :  { %v1942_v39 = vpop.f32.mrb[48].mxu0 }
 0xf77   :  { %v2772_v41 = vpop.f32.mrb[49].mxu0 }
 0xf78   :  { %v1945_v42 = vpop.f32.mrb[50].mxu0  ;;  %v1991_v44 = vpop.f32.mrb[44].mxu1 }
 0xf79   :  { %v2867_v4 = vpack.i.bf16 %v1991_v44, %v1942_v39  ;;  %v2773_v45 = vpop.f32.mrb[51].mxu0  ;;  %v2778_v5 = vpop.f32.mrb[45].mxu1 }
 0xf7a   :  { %v1994_v46 = vpop.f32.mrb[46].mxu1 }
 0xf7b   :  { %v2779_v48 = vpop.f32.mrb[47].mxu1  ;;  %2868 = vrot.lane.b32.xlu1 %v2867_v4, %s3106_s13 }
 0xfed   :  { %v2869_v51 = vpop.permute.xlu1 %2868 }
 0xfee   :  { %v2871_v52 = vunpack.i.h.bf16 %v2869_v51  ;;  %v2870_v53 = vunpack.i.l.bf16 %v2869_v51 }
 0xff0   :  { %v2006_v54 = vsel %vm295_vm1, %v3547_v1, %v2871_v52  ;;  %v2005_v55 = vsel %vm295_vm1, %v3545_v62, %v2870_v53 }
 0xff1   :  { %v2012_v56 = vpack.c.bf16 %v2006_v54, %v2005_v55 }
 0xff3   :  { %2785 = vmatmul.mubr.msk.bf16.vlgmr.msra.gmra.mrb[52].mxu0 %vm123_vm2, %v2012_v56 }
 0xff4   :  { %2804 = vmatprep.mubr.msk.bf16.mxu0 %vm3104_vm0, %v3103_v0  ;;  %2797 = vmatpush3.bf16.msra.mxu0 %v2898_v17 }
 0xff5   :  { %2798 = vmatprep.subr.bf16.mxu0 %v3103_v0 }
 0xff8   :  { %2799 = vmatpush3.bf16.msra.mxu0 %v2899_v13 }
 0xff9   :  { %2800 = vmatprep.subr.bf16.mxu0 %v3103_v0 }
 0xffc   :  { %2801 = vmatpush3.bf16.msra.mxu0 %v2900_v30 }
 0xffd   :  { %2802 = vmatprep.subr.bf16.mxu0 %v3103_v0 }
0x1000   :  { %2803 = vmatpush3.bf16.msra.mxu0 %v2901_v31 }
0x10c6   :  { %v2062_v57 = vpop.f32.mrb[52].mxu0 }
0x10c7   :  { %v2069_v58 = vadd.f32 %v2062_v57, %v3444_v47  ;;  %v2786_v59 = vpop.f32.mrb[53].mxu0 }
0x10c8   :  { %v2065_v60 = vpop.f32.mrb[54].mxu0 }
0x10c9   :  { %v2070_v61 = vadd.f32 %v2065_v60, %v3448_v50  ;;  %v2787_v16 = vpop.f32.mrb[55].mxu0  ;;  %v2071_v63 = vsel %vm123_vm2, %v2069_v58, 0.0 }
0x10ca   :  { %2072 = vadd.xlane.f32.xlu1 %v2071_v63  ;;  %v2902_v63 = vld [vmem:[%s3664_s6] sm:$0xff]  }
0x10cb   :  { %v2074_v1 = vsel %vm123_vm2, %v2070_v61, 0.0 }
0x10cc   :  { %2075 = vadd.xlane.f32.xlu0 %v2074_v1  ;;  %v2903_v1 = vld [vmem:[%s3664_s6 + $0x8] sm:$0xff]   ;;  %s3107_s6 = smov [#allocation10]  }
0x10cd   :  { %s2350_s20 = sshll.u32 %s3107_s6, 4  ;;  %s2351_s20 = int_to_ptr.vmem [resolvable:$true] %s2350_s20 }
0x10ce   :  { %s3041_s18 = scalar_lea.vmem %s2351_s20, 512  ;;  %p3046_p5 = scmp.lt.s32.totalorder %s2351_s20, %s2351_s20 }
0x10cf   :  { %p3042_p4 = scmp.ne.s32.totalorder %s2351_s20, %s3041_s18  ;;  %p3047_p6 = scmp.lt.s32.totalorder %s3041_s18, %s3041_s18 }
0x10d1   :  { %p3048_p7 = por %p3047_p6, %p3046_p5 }
0x10d3   :  { %p3049_p8 = pnand %p3048_p7, %p3042_p4 }
0x10e2   :  { %2200 = vrot.lane.b32.xlu0 %v2106_v19, %s3096_s19 }
0x1157   :  { %v2073_v62 = vpop.xlane.xlu1 %2072 }
0x1158   :  { %v2077_v40 = vmul.f32 0.03125, %v2073_v62 }
0x1159   :  { %v2076_v2 = vpop.xlane.xlu0 %2075 }
0x115a   :  { %v2079_v43 = vsub.f32 %v2069_v58, %v2077_v40  ;;  %v2078_v3 = vmul.f32 0.03125, %v2076_v2 }
0x115c   :  { %v2080_v6 = vsub.f32 %v2070_v61, %v2078_v3  ;;  %v2081_v7 = vmul.f32 %v2079_v43, %v2079_v43 }
0x115d   :  { %v2201_v39 = vpop.permute.xlu0 %2200 }
0x115e   :  { %v2083_v47 = vsel %vm123_vm2, %v2081_v7, 0.0  ;;  %v2082_v8 = vmul.f32 %v2080_v6, %v2080_v6 }
0x115f   :  { %2084 = vadd.xlane.f32.xlu1 %v2083_v47 }
0x1160   :  { %v2086_v50 = vsel %vm123_vm2, %v2082_v8, 0.0 }
0x1163   :  { %2087 = vadd.xlane.f32.xlu1 %v2086_v50 }
0x11ec   :  { %v2085_v20 = vpop.xlane.xlu1 %2084 }
0x11ed   :  { %v2089_v21 = vmul.f32 0.03125, %v2085_v20 }
0x11ef   :  { %v2091_v35 = vadd.f32 1e-05, %v2089_v21 }
0x11f0   :  { %v2088_v22 = vpop.xlane.xlu1 %2087 }
0x11f1   :  { %v2090_v23 = vmul.f32 0.03125, %v2088_v22  ;;  %2944 = vrsqrt.f32 %v2091_v35 }
0x11f3   :  { %v2092_v24 = vadd.f32 1e-05, %v2090_v23 }
0x11f5   :  { %2946 = vrsqrt.f32 %v2092_v24 }
0x11fb   :  { %v2945_v25 = vpop.eup %2944 }
0x11fc   :  { %v2095_v27 = vmul.f32 %v2945_v25, %v2079_v43 }
0x11ff   :  { %v2947_v26 = vpop.eup %2946 }
0x1200   :  { %v2096_v49 = vmul.f32 %v2947_v26, %v2080_v6 }
0x1202   :  { %v2102_v29 = vpack.c.bf16 %v2096_v49, %v2095_v27 }
0x1204   :  { %2793 = vmatmul.mubr.msk.bf16.vlgmr.msra.gmra.mrb[48].mxu1 %vm123_vm2, %v2102_v29 }
0x1205   :  { %2812 = vmatprep.mubr.msk.bf16.mxu1 %vm3104_vm0, %v3103_v0  ;;  %2809 = vmatpush3.bf16.msra.mxu1 %v2902_v63 }
0x1206   :  { %2810 = vmatprep.subr.bf16.mxu1 %v3103_v0 }
0x1209   :  { %2811 = vmatpush3.bf16.msra.mxu1 %v2903_v1 }
0x12d7   :  { %v2156_v33 = vpop.f32.mrb[48].mxu1 }
0x12d8   :  { %v2157_v12 = vadd.f32 %v2156_v33, %v2106_v19  ;;  %v2794_v34 = vpop.f32.mrb[49].mxu1 }
0x12d9   :  { %v2159_v36 = vpop.f32.mrb[50].mxu1 }
0x12da   :  { %v2160_v18 = vadd.f32 %v2159_v36, %v2106_v19  ;;  %v2795_v32 = vpop.f32.mrb[51].mxu1  ;;  %v2163_v28 = vmax.f32 %v2157_v12, 0.0 }
0x12dc   :  { %v2164_v37 = vmax.f32 %v2160_v18, 0.0 }
0x12de   :  { %v2174_v38 = vpack.c.bf16 %v2164_v37, %v2163_v28 }
0x12e0   :  { %2805 = vmatmul.mubr.msk.bf16.vlgmr.msra.gmra.mrb[56].mxu0 %vm1117_vm6, %v2174_v38 }
0x13b3   :  { %v2240_v41 = vpop.f32.mrb[56].mxu0 }
0x13b4   :  { %v2241_v42 = vadd.f32 %v2240_v41, %v2201_v39  ;;  %v2806_v44 = vpop.f32.mrb[57].mxu0 }
0x13b5   :  { %v2243_v4 = vpop.f32.mrb[58].mxu0 }
0x13b6   :  { %v2244_v45 = vadd.f32 %v2243_v4, %v2201_v39  ;;  %v2807_v5 = vpop.f32.mrb[59].mxu0  ;;  %v2247_v46 = vadd.f32 %v2241_v42, %v2095_v27 }
0x13b8   :  { %v2249_v48 = vsel %vm123_vm2, %v2247_v46, 0.0  ;;  %v2248_v51 = vadd.f32 %v2244_v45, %v2096_v49 }
0x13b9   :  { %2250 = vadd.xlane.f32.xlu1 %v2249_v48 }
0x13ba   :  { %v2252_v52 = vsel %vm123_vm2, %v2248_v51, 0.0 }
0x13bd   :  { %2253 = vadd.xlane.f32.xlu1 %v2252_v52 }
0x1446   :  { %v2251_v53 = vpop.xlane.xlu1 %2250 }
0x1447   :  { %v2255_v54 = vmul.f32 0.03125, %v2251_v53 }
0x1449   :  { %v2257_v55 = vsub.f32 %v2247_v46, %v2255_v54 }
0x144a   :  { %v2254_v56 = vpop.xlane.xlu1 %2253 }
0x144b   :  { %v2256_v57 = vmul.f32 0.03125, %v2254_v56  ;;  %v2259_v58 = vmul.f32 %v2257_v55, %v2257_v55 }
0x144d   :  { %v2258_v59 = vsub.f32 %v2248_v51, %v2256_v57  ;;  %v2261_v60 = vsel %vm123_vm2, %v2259_v58, 0.0 }
0x144e   :  { %2262 = vadd.xlane.f32.xlu1 %v2261_v60 }
0x144f   :  { %v2260_v61 = vmul.f32 %v2258_v59, %v2258_v59 }
0x1451   :  { %v2264_v16 = vsel %vm123_vm2, %v2260_v61, 0.0 }
0x1452   :  { %2265 = vadd.xlane.f32.xlu1 %v2264_v16 }
0x14db   :  { %v2263_v62 = vpop.xlane.xlu1 %2262 }
0x14dc   :  { %v2267_v40 = vmul.f32 0.03125, %v2263_v62 }
0x14de   :  { %v2269_v2 = vadd.f32 1e-05, %v2267_v40 }
0x14df   :  { %v2266_v43 = vpop.xlane.xlu1 %2265 }
0x14e0   :  { %2948 = vrsqrt.f32 %v2269_v2  ;;  %v2268_v3 = vmul.f32 0.03125, %v2266_v43 }
0x14e2   :  { %v2270_v6 = vadd.f32 1e-05, %v2268_v3 }
0x14e4   :  { %2950 = vrsqrt.f32 %v2270_v6 }
0x14ea   :  { %v2949_v7 = vpop.eup %2948 }
0x14eb   :  { %v2273_v47 = vmul.f32 %v2949_v7, %v2257_v55 }
0x14ed   :  { %2276 = vst.msk [vmem:[#allocation10 + $0x10] sm:$0xff] %vm123_vm2, %v2273_v47 }
0x14ee   :  { %v2951_v8 = vpop.eup %2950 }
0x14ef   :  { %v2274_v50 = vmul.f32 %v2951_v8, %v2258_v59 }
0x14f1   :  { %2277 = vst.msk [vmem:[#allocation10 + $0x18] sm:$0xff] %vm123_vm2, %v2274_v50  ;;  %v2282_v0 = vpack.c.bf16 %v2274_v50, %v2273_v47 }
0x14f3   :  { %2813 = vmatmul.mubr.msk.bf16.vlgmr.msra.gmra.mrb[52].mxu1 %vm123_vm2, %v2282_v0 }
0x14f4   :  { %3052 = shalt.err (!%p3049_p8)
}
0x14f5   :  { %s3053_s26 = scalar_lea.hbm %s3666_s8, 512 }
0x14f6   :  { %p3054_p9 = scmp.ne.s32.totalorder %s3666_s8, %s3053_s26  ;;  %p3057_p10 = scmp.lt.u32.totalorder %s3053_s26, %s3666_s8 }
0x14f8   :  { %p3059_p11 = pnand %p3057_p10, %p3054_p9 }
0x14fa   :  { %3062 = shalt.err (!%p3059_p11)
}
0x14fb   :  { %2356 = dma.vmem_to_hbm [thread:$0]  %s2351_s20, 512, %s3666_s8, [#allocation4], %s3099_s1, %s3099_s1, %s3100_s10   ;;  %v2285_v9 = vsub.s32 2, %v3275_v14 }
0x14fc   :  { %s3108_s12 = smov [#allocation11]  }
0x14fd   :  { %v2286_v10 = vrot.slane %v3595_v15, %v2285_v9  ;;  %s2362_s2 = sshll.u32 %s3108_s12, 4  ;;  %s2363_s2 = int_to_ptr.vmem [resolvable:$true] %s2362_s2 }
0x14fe   :  { %s3063_s30 = scalar_lea.vmem %s2363_s2, 256  ;;  %p3068_p13 = scmp.lt.s32.totalorder %s2363_s2, %s2363_s2 }
0x14ff   :  { %p3064_p12 = scmp.ne.s32.totalorder %s2363_s2, %s3063_s30  ;;  %p3069_p0 = scmp.lt.s32.totalorder %s3063_s30, %s3063_s30 }
0x1501   :  { %p3070_p1 = por %p3069_p0, %p3068_p13 }
0x1503   :  { %p3071_p2 = pnand %p3070_p1, %p3064_p12 }
0x15c6   :  { %v2336_v17 = vpop.f32.mrb[52].mxu1 }
0x15c7   :  { %v2337_v11 = vadd.f32 %v2336_v17, %v2286_v10  ;;  %v2814_v13 = vpop.f32.mrb[53].mxu1 }
0x15c8   :  { %v2339_v19 = vpop.f32.mrb[54].mxu1 }
0x15c9   :  { %2343 = vst [vmem:[#allocation11] sm:$0xff] %v2337_v11  ;;  %v2340_v20 = vadd.f32 %v2339_v19, %v2286_v10  ;;  %v2815_v21 = vpop.f32.mrb[55].mxu1 }
0x15cb   :  { %2344 = vst [vmem:[#allocation11 + $0x8] sm:$0xff] %v2340_v20 }
0x15cc   :  { %3074 = shalt.err (!%p3071_p2)
}
0x15cd   :  { %s3075_s14 = scalar_lea.hbm %s3667_s9, 256 }
0x15ce   :  { %p3076_p3 = scmp.ne.s32.totalorder %s3667_s9, %s3075_s14  ;;  %p3079_p4 = scmp.lt.u32.totalorder %s3075_s14, %s3667_s9 }
0x15d0   :  { %p3081_p5 = pnand %p3079_p4, %p3076_p3 }
0x15d2   :  { %3084 = shalt.err (!%p3081_p5)
}
0x15d3   :  { %2368 = dma.vmem_to_hbm [thread:$0]  %s2363_s2, 256, %s3667_s9, [#allocation12], %s3099_s1, %s3099_s1, %s3100_s10  }
0x15d4   :  { %3091 = dma.done.wait [#allocation4], 512  }
0x15d5   :  { %3092 = vsyncadd [#allocation4], 4294966784 }
0x15d6   :  { %3093 = dma.done.wait [#allocation12], 256  }
0x15d7   :  { %3094 = vsyncadd [#allocation12], 4294967040 }
0x15d8   :  { %2375 = vsyncpa [#allocation3], 1 }
0x15d9   :  { %2376 = vsyncpa [#allocation6], 1 }
0x15da   :  { %2377 = vsyncpa [#allocation9], 1 }
0x15db   :  { %2378 = vsyncpa [#allocation4], 1 }
0x15dc   :  { %2379 = vsyncpa [#allocation12], 1 }

</bundles_post_ra>
